<compile_context>
chip_gen: v7x
topology: tpu7x:2x2x1
jax: 0.10.0
libtpu: 0.0.40
codegen_flags: <defaults>
</compile_context>

<pallas_src>
import functools

import jax
import jax.numpy as jnp
from jax.experimental import pallas as pl
from jax.experimental.pallas import tpu as pltpu


def _round_up(n, m):
    return (n + m - 1) // m * m


def _msh_kernel(x_ref, w1a_ref, w2a_ref, wf1_ref, sh1_ref, wf2_ref, sh2_ref,
                out_ref, *, bt, t, t_valid):
    Cp = x_ref.shape[0]
    x = x_ref[...]                                           # (Cp, bt*t) f32, lane-dense

    # ---------------- ChannelAttention: per-batch avg/max pools ----------------
    # Each batch occupies an aligned, 128-multiple-wide lane segment -> slices are views.
    if t_valid < t:                                          # time axis was zero-padded
        valid = jax.lax.broadcasted_iota(jnp.int32, (Cp, t), 1) < t_valid
    cols = []
    for b in range(bt):                                      # avg pool
        seg = x[:, b * t:(b + 1) * t]
        cols.append(jnp.sum(seg, axis=-1, keepdims=True) * (1.0 / t_valid))
    for b in range(bt):                                      # max pool
        seg = x[:, b * t:(b + 1) * t]
        if t_valid < t:
            seg = jnp.where(valid, seg, -jnp.inf)
        cols.append(jnp.max(seg, axis=-1, keepdims=True))
    pooled = jnp.concatenate(cols, axis=-1).astype(jnp.bfloat16)      # (Cp, 2*bt) tiny

    h = jnp.dot(w1a_ref[...], pooled, preferred_element_type=jnp.float32)
    h = jnp.maximum(h, 0.0)                                            # (Crp, 2*bt)
    z = jnp.dot(w2a_ref[...], h.astype(jnp.bfloat16),
                preferred_element_type=jnp.float32)                    # (Cp, 2*bt)
    attn = jax.nn.sigmoid(z[:, :bt] + z[:, bt:])                       # (Cp, bt) f32

    # ------- attention-scaled features: one lane-dense bf16 slab for the MXU -------
    feat = jnp.concatenate(
        [(x[:, b * t:(b + 1) * t] * attn[:, b:b + 1]).astype(jnp.bfloat16)
         for b in range(bt)], axis=-1)                                 # (Cp, bt*t)

    # ------- fusion 1x1 convs (conv bias + eval-mode BN folded into weight/shift) -------
    h1 = jnp.dot(wf1_ref[...], feat, preferred_element_type=jnp.float32) + sh1_ref[...]
    h1 = jnp.maximum(h1, 0.0)                                          # (H, bt*t) f32
    y = jnp.dot(wf2_ref[...], h1.astype(jnp.bfloat16),
                preferred_element_type=jnp.float32) + sh2_ref[...]     # (Cp, bt*t) f32

    # ------- residual (Identity proj) + ReLU: single lane-dense store -------
    out_ref[...] = jnp.maximum(y + x, 0.0)


@functools.partial(jax.jit, static_argnames=("batch_block",))
def msh_feature_extractor(x, prep, batch_block=8):
    """x: (B, C, T) float32. prep: kernel-ready params from prepare_params()."""
    B, C, T = x.shape
    Cp = prep["w_f2"].shape[0]
    Crp = prep["w1_attn"].shape[0]
    H = prep["w_f1"].shape[0]

    Tp = _round_up(T, 128)                               # lane-aligned time
    Bt = max(1, min(batch_block, B))
    # VMEM budget per step: double-buffered in+out blocks (2*2*Cp*Nt*4 B) plus roughly
    # (2+4+4)*Cp*Nt + 4*H*Nt B of intermediates (feat bf16, h1, y). Keep it well under the
    # default scoped limit (16 MiB v5e, 32 MiB v6e/v7x); back Bt off if T is huge.
    while Bt > 1 and (16 * Cp + 10 * Cp + 4 * H) * (Bt * Tp) > 12 * (1 << 20):
        Bt = (Bt + 1) // 2
    Bp = _round_up(B, Bt)
    n_blocks = Bp // Bt                                  # >= 2 lets v7x use both TensorCores
    Nt = Bt * Tp

    # Channel-major, lane-dense layout: one XLA pad/transpose/reshape outside the kernel.
    xp = jnp.pad(x, ((0, Bp - B), (0, Cp - C), (0, Tp - T)))        # (Bp, Cp, Tp)
    x2d = jnp.transpose(xp, (1, 0, 2)).reshape(Cp, Bp * Tp)         # (Cp, Bp*Tp)

    kernel = functools.partial(_msh_kernel, bt=Bt, t=Tp, t_valid=T)
    rep = lambda shape: pl.BlockSpec(shape, lambda i: (0, 0))

    out2d = pl.pallas_call(
        kernel,
        out_shape=jax.ShapeDtypeStruct((Cp, Bp * Tp), jnp.float32),
        grid=(n_blocks,),
        in_specs=[
            pl.BlockSpec((Cp, Nt), lambda i: (0, i)),   # x block: all channels, Bt batches' time
            rep((Crp, Cp)),                             # attention MLP W1 (bf16)
            rep((Cp, Crp)),                             # attention MLP W2 (bf16)
            rep((H, Cp)),                               # fusion conv1 weight (BN folded, bf16)
            rep((H, 1)),                                # fusion conv1 shift  (bias+BN folded)
            rep((Cp, H)),                               # fusion conv2 weight (BN folded, bf16)
            rep((Cp, 1)),                               # fusion conv2 shift  (bias+BN folded)
        ],
        out_specs=pl.BlockSpec((Cp, Nt), lambda i: (0, i)),
        input_output_aliases={0: 0},                    # output reuses x2d's HBM buffer
        compiler_params=pltpu.CompilerParams(
            dimension_semantics=("parallel",)),
    )(x2d, prep["w1_attn"], prep["w2_attn"], prep["w_f1"], prep["shift1"],
      prep["w_f2"], prep["shift2"])

    out = out2d.reshape(Cp, Bp, Tp).transpose(1, 0, 2)              # back to (B, C, T)
    return out[:B, :C, :T]


def make_params(key, C=132, reduction=16, hidden=64):
    """Raw PyTorch-style parameters (Conv1d weights/biases, eval-mode BN stats)."""
    Cr = max(C // reduction, 1)     # 132 // 16 = 8
    ks = jax.random.split(key, 14)
    f32 = jnp.float32
    return dict(
        w1_attn=0.1 * jax.random.normal(ks[0], (Cr, C), f32),      # Conv1d(C, C//16, 1, bias=False)
        w2_attn=0.1 * jax.random.normal(ks[1], (C, Cr), f32),      # Conv1d(C//16, C, 1, bias=False)
        w_f1=0.1 * jax.random.normal(ks[2], (hidden, C), f32),     # Conv1d(C, 64, 1)
        b_f1=0.1 * jax.random.normal(ks[3], (hidden,), f32),
        gamma1=1.0 + 0.1 * jax.random.normal(ks[4], (hidden,), f32),
        beta1=0.1 * jax.random.normal(ks[5], (hidden,), f32),
        rm1=0.1 * jax.random.normal(ks[6], (hidden,), f32),
        rv1=1.0 + 0.1 * jnp.abs(jax.random.normal(ks[7], (hidden,), f32)),
        w_f2=0.1 * jax.random.normal(ks[8], (C, hidden), f32),     # Conv1d(64, C, 1)
        b_f2=0.1 * jax.random.normal(ks[9], (C,), f32),
        gamma2=1.0 + 0.1 * jax.random.normal(ks[10], (C,), f32),
        beta2=0.1 * jax.random.normal(ks[11], (C,), f32),
        rm2=0.1 * jax.random.normal(ks[12], (C,), f32),
        rv2=1.0 + 0.1 * jnp.abs(jax.random.normal(ks[13], (C,), f32)),
    )


def prepare_params(raw, *, eps=1e-5, mxu_dtype=jnp.bfloat16):
    """Fold conv bias + eval-mode BN into weights/shifts, pad channel dims to multiples of 16
    (bf16 sublane packing), and cast all MXU weights to bf16."""
    C = raw["w_f2"].shape[0]
    Cr = raw["w1_attn"].shape[0]
    Cp = _round_up(C, 16)
    Crp = _round_up(Cr, 16)
    pc, pr = Cp - C, Crp - Cr

    s1 = raw["gamma1"] / jnp.sqrt(raw["rv1"] + eps)
    wf1 = s1[:, None] * raw["w_f1"]                          # (H, C)
    shift1 = (s1 * raw["b_f1"] + raw["beta1"] - raw["rm1"] * s1)[:, None]    # (H, 1)

    s2 = raw["gamma2"] / jnp.sqrt(raw["rv2"] + eps)
    wf2 = s2[:, None] * raw["w_f2"]                          # (C, H)
    shift2 = (s2 * raw["b_f2"] + raw["beta2"] - raw["rm2"] * s2)[:, None]    # (C, 1)

    return dict(
        w1_attn=jnp.pad(raw["w1_attn"], ((0, pr), (0, pc))).astype(mxu_dtype),
        w2_attn=jnp.pad(raw["w2_attn"], ((0, pc), (0, pr))).astype(mxu_dtype),
        w_f1=jnp.pad(wf1, ((0, 0), (0, pc))).astype(mxu_dtype),
        shift1=shift1.astype(jnp.float32),
        w_f2=jnp.pad(wf2, ((0, pc), (0, 0))).astype(mxu_dtype),
        shift2=jnp.pad(shift2, ((0, pc), (0, 0))).astype(jnp.float32),
    )


def _reference(x, raw, eps=1e-5):
    """Pure-JAX f32 reference mirroring the PyTorch forward (eval-mode BN)."""
    avg = jnp.mean(x, axis=-1, keepdims=True)
    mx = jnp.max(x, axis=-1, keepdims=True)

    def mlp(v):  # v: (B, C, 1)
        h = jnp.maximum(jnp.einsum("rc,bct->brt", raw["w1_attn"], v), 0.0)
        return jnp.einsum("cr,brt->bct", raw["w2_attn"], h)

    attn = jax.nn.sigmoid(mlp(avg) + mlp(mx))
    feat = x * attn

    s1 = raw["gamma1"] / jnp.sqrt(raw["rv1"] + eps)
    s2 = raw["gamma2"] / jnp.sqrt(raw["rv2"] + eps)
    h = jnp.einsum("hc,bct->bht", raw["w_f1"], feat) + raw["b_f1"][None, :, None]
    h = (h - raw["rm1"][None, :, None]) * s1[None, :, None] + raw["beta1"][None, :, None]
    h = jnp.maximum(h, 0.0)
    y = jnp.einsum("ch,bht->bct", raw["w_f2"], h) + raw["b_f2"][None, :, None]
    y = (y - raw["rm2"][None, :, None]) * s2[None, :, None] + raw["beta2"][None, :, None]
    return jnp.maximum(y + x, 0.0)   # residual_proj is Identity (in_channels == out_channels)


if __name__ == "__main__":
    B, C, T = 4, 132, 128   # in_channels=132 (module default), small batch/time
    key = jax.random.PRNGKey(0)
    kx, kp = jax.random.split(key)
    x = jax.random.normal(kx, (B, C, T), jnp.float32)

    raw = make_params(kp, C=C)
    prep = prepare_params(raw)

    # batch_block=2 -> grid of 2 steps so both v7x TensorCores get work; lane width = 256.
    out = msh_feature_extractor(x, prep, batch_block=2)
    out = jax.block_until_ready(out)

    ref = _reference(x, raw)
    assert out.shape == (B, C, T)
    max_err = float(jnp.max(jnp.abs(out - ref)))
    # All matmuls run with bf16 MXU inputs (f32 accumulate) -> relaxed tolerance vs f32 ref.
    assert jnp.allclose(out, ref, atol=1e-1, rtol=1e-1), max_err
    print("KERNEL_OK")
</pallas_src>

<mosaic_0001>
module attributes {stable_mosaic.version = 11 : i64} {
  func.func @_msh_kernel(%arg0: i32, %arg1: memref<144x256xf32, #tpu.memory_space<vmem>>, %arg2: memref<16x144xbf16, #tpu.memory_space<vmem>>, %arg3: memref<144x16xbf16, #tpu.memory_space<vmem>>, %arg4: memref<64x144xbf16, #tpu.memory_space<vmem>>, %arg5: memref<64x1xf32, #tpu.memory_space<vmem>>, %arg6: memref<144x64xbf16, #tpu.memory_space<vmem>>, %arg7: memref<144x1xf32, #tpu.memory_space<vmem>>, %arg8: memref<144x256xf32, #tpu.memory_space<vmem>>) attributes {dimension_semantics = [#tpu.dimension_semantics<parallel>], iteration_bounds = array<i64: 2>, scalar_prefetch = 0 : i64, scratch_operands = 0 : i64, tpu.core_type = #tpu.core_type<tc>, window_params = [{transform_indices = @transform_0, window_bounds = array<i64: 144, 256>}, {pipeline_mode = #tpu.pipeline_mode<synchronous>, transform_indices = @transform_1, window_bounds = array<i64: 16, 144>}, {pipeline_mode = #tpu.pipeline_mode<synchronous>, transform_indices = @transform_2, window_bounds = array<i64: 144, 16>}, {pipeline_mode = #tpu.pipeline_mode<synchronous>, transform_indices = @transform_3, window_bounds = array<i64: 64, 144>}, {pipeline_mode = #tpu.pipeline_mode<synchronous>, transform_indices = @transform_4, window_bounds = array<i64: 64, 1>}, {pipeline_mode = #tpu.pipeline_mode<synchronous>, transform_indices = @transform_5, window_bounds = array<i64: 144, 64>}, {pipeline_mode = #tpu.pipeline_mode<synchronous>, transform_indices = @transform_6, window_bounds = array<i64: 144, 1>}, {transform_indices = @transform_7, window_bounds = array<i64: 144, 256>}]} {
    %c0 = arith.constant 0 : index
    %c0_0 = arith.constant 0 : index
    %0 = vector.load %arg1[%c0, %c0_0] : memref<144x256xf32, #tpu.memory_space<vmem>>, vector<144x256xf32>
    %1 = vector.extract_strided_slice %0 {offsets = [0, 0], sizes = [144, 128], strides = [1, 1]} : vector<144x256xf32> to vector<144x128xf32>
    %cst = arith.constant dense<0.000000e+00> : vector<144xf32>
    %2 = vector.multi_reduction <add>, %1, %cst [1] : vector<144x128xf32> to vector<144xf32>
    %3 = vector.shape_cast %2 : vector<144xf32> to vector<144x1xf32>
    %cst_1 = arith.constant 7.812500e-03 : f32
    %4 = vector.broadcast %cst_1 : f32 to vector<144x1xf32>
    %5 = arith.mulf %3, %4 : vector<144x1xf32>
    %6 = vector.extract_strided_slice %0 {offsets = [0, 128], sizes = [144, 128], strides = [1, 1]} : vector<144x256xf32> to vector<144x128xf32>
    %cst_2 = arith.constant dense<0.000000e+00> : vector<144xf32>
    %7 = vector.multi_reduction <add>, %6, %cst_2 [1] : vector<144x128xf32> to vector<144xf32>
    %8 = vector.shape_cast %7 : vector<144xf32> to vector<144x1xf32>
    %cst_3 = arith.constant 7.812500e-03 : f32
    %9 = vector.broadcast %cst_3 : f32 to vector<144x1xf32>
    %10 = arith.mulf %8, %9 : vector<144x1xf32>
    %11 = vector.extract_strided_slice %0 {offsets = [0, 0], sizes = [144, 128], strides = [1, 1]} : vector<144x256xf32> to vector<144x128xf32>
    %cst_4 = arith.constant dense<0xFF800000> : vector<144xf32>
    %12 = vector.multi_reduction <maximumf>, %11, %cst_4 [1] : vector<144x128xf32> to vector<144xf32>
    %13 = vector.shape_cast %12 : vector<144xf32> to vector<144x1xf32>
    %14 = vector.extract_strided_slice %0 {offsets = [0, 128], sizes = [144, 128], strides = [1, 1]} : vector<144x256xf32> to vector<144x128xf32>
    %cst_5 = arith.constant dense<0xFF800000> : vector<144xf32>
    %15 = vector.multi_reduction <maximumf>, %14, %cst_5 [1] : vector<144x128xf32> to vector<144xf32>
    %16 = vector.shape_cast %15 : vector<144xf32> to vector<144x1xf32>
    %17 = tpu.concatenate %5, %10, %13, %16 in 1 : vector<144x1xf32>, vector<144x1xf32>, vector<144x1xf32>, vector<144x1xf32> -> vector<144x4xf32>
    %18 = arith.truncf %17 : vector<144x4xf32> to vector<144x4xbf16>
    %c0_6 = arith.constant 0 : index
    %c0_7 = arith.constant 0 : index
    %19 = vector.load %arg2[%c0_6, %c0_7] : memref<16x144xbf16, #tpu.memory_space<vmem>>, vector<16x144xbf16>
    %cst_8 = arith.constant dense<0.000000e+00> : vector<16x4xf32>
    %20 = tpu.matmul %19, %18, %cst_8 {dimension_numbers = #tpu.dot_dimension_numbers<[1], [0], [0], [1], [0, 0, 1, 1], [], []>} : vector<16x144xbf16>, vector<144x4xbf16>, vector<16x4xf32> -> vector<16x4xf32>
    %cst_9 = arith.constant 0.000000e+00 : f32
    %21 = vector.broadcast %cst_9 : f32 to vector<16x4xf32>
    %22 = arith.maximumf %20, %21 : vector<16x4xf32>
    %c0_10 = arith.constant 0 : index
    %c0_11 = arith.constant 0 : index
    %23 = vector.load %arg3[%c0_10, %c0_11] : memref<144x16xbf16, #tpu.memory_space<vmem>>, vector<144x16xbf16>
    %24 = arith.truncf %22 : vector<16x4xf32> to vector<16x4xbf16>
    %cst_12 = arith.constant dense<0.000000e+00> : vector<144x4xf32>
    %25 = tpu.matmul %23, %24, %cst_12 {dimension_numbers = #tpu.dot_dimension_numbers<[1], [0], [0], [1], [0, 0, 1, 1], [], []>} : vector<144x16xbf16>, vector<16x4xbf16>, vector<144x4xf32> -> vector<144x4xf32>
    %26 = vector.extract_strided_slice %25 {offsets = [0, 0], sizes = [144, 2], strides = [1, 1]} : vector<144x4xf32> to vector<144x2xf32>
    %27 = vector.extract_strided_slice %25 {offsets = [0, 2], sizes = [144, 2], strides = [1, 1]} : vector<144x4xf32> to vector<144x2xf32>
    %28 = arith.addf %26, %27 : vector<144x2xf32>
    %29 = arith.negf %28 : vector<144x2xf32>
    %30 = math.exp %29 : vector<144x2xf32>
    %cst_13 = arith.constant 1.000000e+00 : f32
    %31 = vector.broadcast %cst_13 : f32 to vector<144x2xf32>
    %32 = arith.addf %31, %30 : vector<144x2xf32>
    %33 = arith.divf %31, %32 : vector<144x2xf32>
    %34 = vector.extract_strided_slice %0 {offsets = [0, 0], sizes = [144, 128], strides = [1, 1]} : vector<144x256xf32> to vector<144x128xf32>
    %35 = vector.extract_strided_slice %33 {offsets = [0, 0], sizes = [144, 1], strides = [1, 1]} : vector<144x2xf32> to vector<144x1xf32>
    %36 = vector.broadcast %35 : vector<144x1xf32> to vector<144x128xf32>
    %37 = arith.mulf %34, %36 : vector<144x128xf32>
    %38 = arith.truncf %37 : vector<144x128xf32> to vector<144x128xbf16>
    %39 = vector.extract_strided_slice %0 {offsets = [0, 128], sizes = [144, 128], strides = [1, 1]} : vector<144x256xf32> to vector<144x128xf32>
    %40 = vector.extract_strided_slice %33 {offsets = [0, 1], sizes = [144, 1], strides = [1, 1]} : vector<144x2xf32> to vector<144x1xf32>
    %41 = vector.broadcast %40 : vector<144x1xf32> to vector<144x128xf32>
    %42 = arith.mulf %39, %41 : vector<144x128xf32>
    %43 = arith.truncf %42 : vector<144x128xf32> to vector<144x128xbf16>
    %44 = tpu.concatenate %38, %43 in 1 : vector<144x128xbf16>, vector<144x128xbf16> -> vector<144x256xbf16>
    %c0_14 = arith.constant 0 : index
    %c0_15 = arith.constant 0 : index
    %45 = vector.load %arg4[%c0_14, %c0_15] : memref<64x144xbf16, #tpu.memory_space<vmem>>, vector<64x144xbf16>
    %cst_16 = arith.constant dense<0.000000e+00> : vector<64x256xf32>
    %46 = tpu.matmul %45, %44, %cst_16 {dimension_numbers = #tpu.dot_dimension_numbers<[1], [0], [0], [1], [0, 0, 1, 1], [], []>} : vector<64x144xbf16>, vector<144x256xbf16>, vector<64x256xf32> -> vector<64x256xf32>
    %c0_17 = arith.constant 0 : index
    %c0_18 = arith.constant 0 : index
    %47 = vector.load %arg5[%c0_17, %c0_18] : memref<64x1xf32, #tpu.memory_space<vmem>>, vector<64x1xf32>
    %48 = vector.broadcast %47 : vector<64x1xf32> to vector<64x256xf32>
    %49 = arith.addf %46, %48 : vector<64x256xf32>
    %cst_19 = arith.constant 0.000000e+00 : f32
    %50 = vector.broadcast %cst_19 : f32 to vector<64x256xf32>
    %51 = arith.maximumf %49, %50 : vector<64x256xf32>
    %c0_20 = arith.constant 0 : index
    %c0_21 = arith.constant 0 : index
    %52 = vector.load %arg6[%c0_20, %c0_21] : memref<144x64xbf16, #tpu.memory_space<vmem>>, vector<144x64xbf16>
    %53 = arith.truncf %51 : vector<64x256xf32> to vector<64x256xbf16>
    %cst_22 = arith.constant dense<0.000000e+00> : vector<144x256xf32>
    %54 = tpu.matmul %52, %53, %cst_22 {dimension_numbers = #tpu.dot_dimension_numbers<[1], [0], [0], [1], [0, 0, 1, 1], [], []>} : vector<144x64xbf16>, vector<64x256xbf16>, vector<144x256xf32> -> vector<144x256xf32>
    %c0_23 = arith.constant 0 : index
    %c0_24 = arith.constant 0 : index
    %55 = vector.load %arg7[%c0_23, %c0_24] : memref<144x1xf32, #tpu.memory_space<vmem>>, vector<144x1xf32>
    %56 = vector.broadcast %55 : vector<144x1xf32> to vector<144x256xf32>
    %57 = arith.addf %54, %56 : vector<144x256xf32>
    %58 = arith.addf %57, %0 : vector<144x256xf32>
    %cst_25 = arith.constant 0.000000e+00 : f32
    %59 = vector.broadcast %cst_25 : f32 to vector<144x256xf32>
    %60 = arith.maximumf %58, %59 : vector<144x256xf32>
    %c0_26 = arith.constant 0 : index
    %c0_27 = arith.constant 0 : index
    %61 = vector.load %arg8[%c0_26, %c0_27] : memref<144x256xf32, #tpu.memory_space<vmem>>, vector<144x256xf32>
    tpu.vector_store %arg8[%c0_26, %c0_27], %60 {strides = array<i32>} : memref<144x256xf32, #tpu.memory_space<vmem>>, vector<144x256xf32>,
    return
  }
  func.func @transform_0(%arg0: i32) -> (i32, i32) {
    %c0_i32 = arith.constant 0 : i32
    %c0_i32_0 = arith.constant 0 : i32
    return %c0_i32, %arg0 : i32, i32
  }
  func.func @transform_1(%arg0: i32) -> (i32, i32) {
    %c0_i32 = arith.constant 0 : i32
    %c0_i32_0 = arith.constant 0 : i32
    %c0_i32_1 = arith.constant 0 : i32
    return %c0_i32, %c0_i32_0 : i32, i32
  }
  func.func @transform_2(%arg0: i32) -> (i32, i32) {
    %c0_i32 = arith.constant 0 : i32
    %c0_i32_0 = arith.constant 0 : i32
    %c0_i32_1 = arith.constant 0 : i32
    return %c0_i32, %c0_i32_0 : i32, i32
  }
  func.func @transform_3(%arg0: i32) -> (i32, i32) {
    %c0_i32 = arith.constant 0 : i32
    %c0_i32_0 = arith.constant 0 : i32
    %c0_i32_1 = arith.constant 0 : i32
    return %c0_i32, %c0_i32_0 : i32, i32
  }
  func.func @transform_4(%arg0: i32) -> (i32, i32) {
    %c0_i32 = arith.constant 0 : i32
    %c0_i32_0 = arith.constant 0 : i32
    %c0_i32_1 = arith.constant 0 : i32
    return %c0_i32, %c0_i32_0 : i32, i32
  }
  func.func @transform_5(%arg0: i32) -> (i32, i32) {
    %c0_i32 = arith.constant 0 : i32
    %c0_i32_0 = arith.constant 0 : i32
    %c0_i32_1 = arith.constant 0 : i32
    return %c0_i32, %c0_i32_0 : i32, i32
  }
  func.func @transform_6(%arg0: i32) -> (i32, i32) {
    %c0_i32 = arith.constant 0 : i32
    %c0_i32_0 = arith.constant 0 : i32
    %c0_i32_1 = arith.constant 0 : i32
    return %c0_i32, %c0_i32_0 : i32, i32
  }
  func.func @transform_7(%arg0: i32) -> (i32, i32) {
    %c0_i32 = arith.constant 0 : i32
    %c0_i32_0 = arith.constant 0 : i32
    return %c0_i32, %arg0 : i32, i32
  }
}

</mosaic_0001>

<bundles_post_ra>
// kernel: msh_feature_extractor.1
= control target key start
LH: loop header
LB: loop body
LE: loop exit
PB: predicated region body
PF: predicated region fallthrough
CT: control target
= control target key end

     0   :  { %s2490_s24 = smov 0   ;;  %s2492_s25 = smov 0   ;;  %s3347_s0 = inlined_call_operand.vmem [shape: f32[144,512], index: 0, kind: input, shape index: {}, may-alias: {0,7}]   ;;  %s3348_s1 = inlined_call_operand.vmem [shape: bf16[16,144], index: 1, kind: input, shape index: {}]   ;;  %s3349_s2 = inlined_call_operand.vmem [shape: bf16[144,16], index: 2, kind: input, shape index: {}]   ;;  %s3350_s3 = inlined_call_operand.vmem [shape: bf16[64,144], index: 3, kind: input, shape index: {}]   ;;  %s3351_s4 = inlined_call_operand.vmem [shape: f32[64,1], index: 4, kind: input, shape index: {}]   ;;  %s3352_s5 = inlined_call_operand.vmem [shape: bf16[144,64], index: 5, kind: input, shape index: {}]   ;;  %s3353_s6 = inlined_call_operand.vmem [shape: f32[144,1], index: 6, kind: input, shape index: {}]   ;;  %s3354_s7 = inlined_call_operand.vmem [shape: f32[144,512], index: 7, kind: output, shape index: {}, may-alias: {0,7}]  }
   0x1   :  { %s2494_s26 = smov 0  }
   0x2 LB: > { %s2100_s27 = sadd.s32 4294967295, %s2443_s26   ;;  %s2507_s28 = sadd.s32 1, %s2443_s26   ;;  %s2443_s26 = sphi %s2494_s26, %s3358_s26   ;;  %s2439_s25 = sphi %s2492_s25, %s3357_s25   ;;  %s2435_s24 = sphi %s2490_s24, %s3356_s24  }
   0x3   : > { %s21_s29 = ssub.s32 %s2443_s26, %s2507_s28  ;;  %s24_s30 = sadd.s32 1, %s2439_s25 }
   0x4   : > { %p22_p0 = scmp.eq.s32.totalorder %s21_s29, 0  ;;  %p31_p1 = scmp.ne.s32.totalorder %s2439_s25, %s2435_s24 }
   0x5   : > { %p32_p2 = scmp.eq.s32.totalorder %s2443_s26, 0  ;;  %p187_p3 = scmp.eq.s32.totalorder %s2100_s27, 1 }
   0x6   : > { %s2518_s8 = scalar_select %p22_p0, %s2439_s25, %s24_s30  }
   0x7   : > { %p33_p4 = por %p32_p2, %p31_p1  ;;  %p2520_p5 = por %p187_p3, %p31_p1 }
   0x8   : > { %p2103_p6 = scmp.ge.s32.totalorder %s2443_s26, 2 }
   0xa   : > { %227 = sbr.rel (%p2103_p6) target bundleno = 39 (0x27), region = 40 }
  0x11   : > { %230 = sbr.rel (!%p33_p4) target bundleno = 39 (0x27), region = 44  ;;  %s232_s10 = sand.u32 (%p33_p4), 1, %s2439_s25  }
  0x12   : > { %s2180_s11 = sshll.u32 (%p33_p4), %s2443_s26, 4  ;;  %s2232_s12 = smul.u32 (%p33_p4), 288, %s232_s10 }
  0x13   : > { %s2530_s15 = scalar_lea.vmem (%p33_p4), %s3347_s0, %s2180_s11 }
  0x14   : > { %v250_v0 = vld [vmem:[%s2530_s15] sm:$0xff] (%p33_p4)  ;;  %v252_v1 = vld [vmem:[%s2530_s15 + $0x8] sm:$0xff] (%p33_p4)  ;;  %s2538_s16 = scalar_lea.vmem (%p33_p4), [#allocation2], %s2232_s12 }
  0x15   : > { %v254_v2 = vld [vmem:[%s2530_s15 + $0x20] sm:$0xff] (%p33_p4)  ;;  %v256_v3 = vld [vmem:[%s2530_s15 + $0x28] sm:$0xff] (%p33_p4)  ;;  %251 = vst [vmem:[%s2538_s16] sm:$0xff] (%p33_p4), %v250_v0  ;;  %253 = vst [vmem:[%s2538_s16 + $0x8] sm:$0xff] (%p33_p4), %v252_v1 }
  0x16   : > { %v258_v4 = vld [vmem:[%s2530_s15 + $0x40] sm:$0xff] (%p33_p4)  ;;  %v260_v5 = vld [vmem:[%s2530_s15 + $0x48] sm:$0xff] (%p33_p4)  ;;  %255 = vst [vmem:[%s2538_s16 + $0x10] sm:$0xff] (%p33_p4), %v254_v2  ;;  %257 = vst [vmem:[%s2538_s16 + $0x18] sm:$0xff] (%p33_p4), %v256_v3 }
  0x17   : > { %259 = vst [vmem:[%s2538_s16 + $0x20] sm:$0xff] (%p33_p4), %v258_v4  ;;  %261 = vst [vmem:[%s2538_s16 + $0x28] sm:$0xff] (%p33_p4), %v260_v5  ;;  %v262_v6 = vld [vmem:[%s2530_s15 + $0x60] sm:$0xff] (%p33_p4)  ;;  %v264_v7 = vld [vmem:[%s2530_s15 + $0x68] sm:$0xff] (%p33_p4) }
  0x18   : > { %v266_v8 = vld [vmem:[%s2530_s15 + $0x80] sm:$0xff]  ;;  %263 = vst [vmem:[%s2538_s16 + $0x30] sm:$0xff] %v262_v6  ;;  %265 = vst [vmem:[%s2538_s16 + $0x38] sm:$0xff] %v264_v7  ;;  %v268_v9 = vld [vmem:[%s2530_s15 + $0x88] sm:$0xff] }
  0x19   : > { %267 = vst [vmem:[%s2538_s16 + $0x40] sm:$0xff] %v266_v8  ;;  %v270_v10 = vld [vmem:[%s2530_s15 + $0xa0] sm:$0xff]  ;;  %v272_v11 = vld [vmem:[%s2530_s15 + $0xa8] sm:$0xff]  ;;  %269 = vst [vmem:[%s2538_s16 + $0x48] sm:$0xff] %v268_v9 }
  0x1a   : > { %271 = vst [vmem:[%s2538_s16 + $0x50] sm:$0xff] %v270_v10  ;;  %273 = vst [vmem:[%s2538_s16 + $0x58] sm:$0xff] %v272_v11  ;;  %v274_v12 = vld [vmem:[%s2530_s15 + $0xc0] sm:$0xff]  ;;  %v276_v13 = vld [vmem:[%s2530_s15 + $0xc8] sm:$0xff] }
  0x1b   : > { %v278_v14 = vld [vmem:[%s2530_s15 + $0xe0] sm:$0xff]  ;;  %275 = vst [vmem:[%s2538_s16 + $0x60] sm:$0xff] %v274_v12  ;;  %277 = vst [vmem:[%s2538_s16 + $0x68] sm:$0xff] %v276_v13  ;;  %v280_v15 = vld [vmem:[%s2530_s15 + $0xe8] sm:$0xff] }
  0x1c   : > { %279 = vst [vmem:[%s2538_s16 + $0x70] sm:$0xff] %v278_v14  ;;  %v282_v16 = vld [vmem:[%s2530_s15 + $0x100] sm:$0xff]  ;;  %v284_v17 = vld [vmem:[%s2530_s15 + $0x108] sm:$0xff]  ;;  %281 = vst [vmem:[%s2538_s16 + $0x78] sm:$0xff] %v280_v15 }
  0x1d   : > { %283 = vst [vmem:[%s2538_s16 + $0x80] sm:$0xff] %v282_v16  ;;  %285 = vst [vmem:[%s2538_s16 + $0x88] sm:$0xff] %v284_v17  ;;  %v286_v18 = vld [vmem:[%s2530_s15 + $0x120] sm:$0xff]  ;;  %v288_v19 = vld [vmem:[%s2530_s15 + $0x128] sm:$0xff] }
  0x1e   : > { %v290_v20 = vld [vmem:[%s2530_s15 + $0x140] sm:$0xff]  ;;  %287 = vst [vmem:[%s2538_s16 + $0x90] sm:$0xff] %v286_v18  ;;  %289 = vst [vmem:[%s2538_s16 + $0x98] sm:$0xff] %v288_v19  ;;  %v292_v21 = vld [vmem:[%s2530_s15 + $0x148] sm:$0xff] }
  0x1f   : > { %291 = vst [vmem:[%s2538_s16 + $0xa0] sm:$0xff] %v290_v20  ;;  %v294_v22 = vld [vmem:[%s2530_s15 + $0x160] sm:$0xff]  ;;  %v296_v23 = vld [vmem:[%s2530_s15 + $0x168] sm:$0xff]  ;;  %293 = vst [vmem:[%s2538_s16 + $0xa8] sm:$0xff] %v292_v21 }
  0x20   : > { %295 = vst [vmem:[%s2538_s16 + $0xb0] sm:$0xff] %v294_v22  ;;  %297 = vst [vmem:[%s2538_s16 + $0xb8] sm:$0xff] %v296_v23  ;;  %v298_v24 = vld [vmem:[%s2530_s15 + $0x180] sm:$0xff]  ;;  %v300_v25 = vld [vmem:[%s2530_s15 + $0x188] sm:$0xff] }
  0x21   : > { %v302_v26 = vld [vmem:[%s2530_s15 + $0x1a0] sm:$0xff]  ;;  %299 = vst [vmem:[%s2538_s16 + $0xc0] sm:$0xff] %v298_v24  ;;  %301 = vst [vmem:[%s2538_s16 + $0xc8] sm:$0xff] %v300_v25  ;;  %v304_v27 = vld [vmem:[%s2530_s15 + $0x1a8] sm:$0xff] }
  0x22   : > { %303 = vst [vmem:[%s2538_s16 + $0xd0] sm:$0xff] %v302_v26  ;;  %v306_v28 = vld [vmem:[%s2530_s15 + $0x1c0] sm:$0xff]  ;;  %v308_v29 = vld [vmem:[%s2530_s15 + $0x1c8] sm:$0xff]  ;;  %305 = vst [vmem:[%s2538_s16 + $0xd8] sm:$0xff] %v304_v27 }
  0x23   : > { %307 = vst [vmem:[%s2538_s16 + $0xe0] sm:$0xff] %v306_v28  ;;  %309 = vst [vmem:[%s2538_s16 + $0xe8] sm:$0xff] %v308_v29  ;;  %v310_v30 = vld [vmem:[%s2530_s15 + $0x1e0] sm:$0xff]  ;;  %v312_v31 = vld [vmem:[%s2530_s15 + $0x1e8] sm:$0xff] }
  0x24   : > { %v314_v32 = vld [vmem:[%s2530_s15 + $0x200] sm:$0xff]  ;;  %311 = vst [vmem:[%s2538_s16 + $0xf0] sm:$0xff] %v310_v30  ;;  %313 = vst [vmem:[%s2538_s16 + $0xf8] sm:$0xff] %v312_v31  ;;  %v316_v33 = vld [vmem:[%s2530_s15 + $0x208] sm:$0xff] }
  0x25   : > { %315 = vst [vmem:[%s2538_s16 + $0x100] sm:$0xff] %v314_v32  ;;  %v318_v34 = vld [vmem:[%s2530_s15 + $0x220] sm:$0xff]  ;;  %v320_v35 = vld [vmem:[%s2530_s15 + $0x228] sm:$0xff]  ;;  %317 = vst [vmem:[%s2538_s16 + $0x108] sm:$0xff] %v316_v33 }
  0x26   : > { %319 = vst [vmem:[%s2538_s16 + $0x110] sm:$0xff] %v318_v34  ;;  %321 = vst [vmem:[%s2538_s16 + $0x118] sm:$0xff] %v320_v35 }
  0x27 PF: > { %p2106_p7 = scmp.ge.s32.totalorder %s2443_s26, 1  ;;  %p326_p8 = scmp.lt.s32.totalorder %s2443_s26, 3 }
  0x29   : > { %p327_p9 = pnand %p2106_p7, %p326_p8 }
  0x2a   : > { %s333_s17 = sand.u32 (!%p327_p9), 1, %s2435_s24   ;;  %v2445_v48 = vmov (!%p327_p9), 0   ;;  %vm582_vm0 = vcmask (!%p327_p9), 7168   ;;  %v2282_v23 = vld [vmem:[%s3348_s1 + $0x4] ss:$8 sps:$4 sm:$0xff] (!%p327_p9)   ;;  %vm659_vm1 = vcmask (!%p327_p9), 130048  }
  0x2b   : > { %330 = sbr.rel (%p327_p9) target bundleno = 1708 (0x6ac), region = 67  ;;  %663 = vmatprep.subr.bf16.mxu0 (!%p327_p9), %v2445_v48  ;;  %2264 = vset.pattern.permute.xlu1 (!%p327_p9), %v2445_v48  ;;  %vm601_vm2 = vcmask (!%p327_p9), 15360   ;;  %vm620_vm3 = vcmask (!%p327_p9), 23552   ;;  %vm2447_vm4 = vmmov (!%p327_p9), 0   ;;  %s2448_s10 = smov (!%p327_p9), 126   ;;  %vm1688_vm5 = vcmask (!%p327_p9), 523264  }
  0x2c   : > { %s2609_s18 = smul.u32 (!%p327_p9), 288, %s333_s17  ;;  %2109 = vmatprep.mubr.msk.bf16.mxu0 (!%p327_p9), %vm659_vm1, %v2282_v23 }
  0x2e   : > { %s2612_s19 = scalar_lea.vmem (!%p327_p9), [#allocation2], %s2609_s18  ;;  %s3186_s22 = scalar_lea.vmem (!%p327_p9), [#allocation3], %s2609_s18 }
  0x2f   : > { %v367_v36 = vld [vmem:[%s2612_s19 + $0x8] sm:$0xff] (!%p327_p9)  ;;  %v366_v37 = vld [vmem:[%s2612_s19] sm:$0xff] (!%p327_p9)  ;;  %v369_v38 = vld [vmem:[%s2612_s19 + $0x18] sm:$0xff] (!%p327_p9) }
  0x30   : > { %456 = vadd.xlane.f32.xlu1 (!%p327_p9), %v367_v36  ;;  %402 = vadd.xlane.f32.xlu0 (!%p327_p9), %v366_v37  ;;  %v368_v39 = vld [vmem:[%s2612_s19 + $0x10] sm:$0xff] (!%p327_p9)  ;;  %v370_v41 = vld [vmem:[%s2612_s19 + $0x20] sm:$0xff] (!%p327_p9)  ;;  %v373_v42 = vld [vmem:[%s2612_s19 + $0x38] sm:$0xff] (!%p327_p9) }
  0x31   : > { %v372_v40 = vld [vmem:[%s2612_s19 + $0x30] sm:$0xff] (!%p327_p9)  ;;  %v371_v43 = vld [vmem:[%s2612_s19 + $0x28] sm:$0xff] (!%p327_p9)  ;;  %v374_v45 = vld [vmem:[%s2612_s19 + $0x40] sm:$0xff] (!%p327_p9) }
  0x32   : > { %v376_v44 = vld [vmem:[%s2612_s19 + $0x50] sm:$0xff]  ;;  %v377_v46 = vld [vmem:[%s2612_s19 + $0x58] sm:$0xff]  ;;  %v375_v47 = vld [vmem:[%s2612_s19 + $0x48] sm:$0xff]  ;;  %s2181_s18 = sshll.u32 (%p2520_p5), %s2100_s27, 4 }
  0x33   : > { %v380_v49 = vld [vmem:[%s2612_s19 + $0x70] sm:$0xff]  ;;  %v378_v50 = vld [vmem:[%s2612_s19 + $0x60] sm:$0xff]  ;;  %v381_v51 = vld [vmem:[%s2612_s19 + $0x78] sm:$0xff]  ;;  %s3266_s9 = scalar_lea.vmem (%p2520_p5), %s3354_s7, %s2181_s18 }
  0x34   : > { %458 = vadd.xlane.f32.xlu1 %v369_v38  ;;  %404 = vadd.xlane.f32.xlu0 %v368_v39  ;;  %v379_v52 = vld [vmem:[%s2612_s19 + $0x68] sm:$0xff]  ;;  %v384_v53 = vld [vmem:[%s2612_s19 + $0x90] sm:$0xff]  ;;  %v382_v54 = vld [vmem:[%s2612_s19 + $0x80] sm:$0xff] }
  0x35   : > { %v385_v55 = vld [vmem:[%s2612_s19 + $0x98] sm:$0xff]  ;;  %v383_v56 = vld [vmem:[%s2612_s19 + $0x88] sm:$0xff]  ;;  %v388_v57 = vld [vmem:[%s2612_s19 + $0xb0] sm:$0xff] }
  0x36   : > { %v386_v58 = vld [vmem:[%s2612_s19 + $0xa0] sm:$0xff]  ;;  %v389_v59 = vld [vmem:[%s2612_s19 + $0xb8] sm:$0xff]  ;;  %v387_v60 = vld [vmem:[%s2612_s19 + $0xa8] sm:$0xff] }
  0x37   : > { %v392_v61 = vld [vmem:[%s2612_s19 + $0xd0] sm:$0xff]  ;;  %v390_v62 = vld [vmem:[%s2612_s19 + $0xc0] sm:$0xff]  ;;  %v393_v63 = vld [vmem:[%s2612_s19 + $0xd8] sm:$0xff] }
  0x38   : > { %512 = vmax.xlane.f32.xlu1 %v368_v39  ;;  %510 = vmax.xlane.f32.xlu0 %v366_v37  ;;  %v391_v0 = vld [vmem:[%s2612_s19 + $0xc8] sm:$0xff]  ;;  %v396_v1 = vld [vmem:[%s2612_s19 + $0xf0] sm:$0xff]  ;;  %v394_v2 = vld [vmem:[%s2612_s19 + $0xe0] sm:$0xff] }
  0x39   : > { %v397_v3 = vld [vmem:[%s2612_s19 + $0xf8] sm:$0xff]  ;;  %v395_v4 = vld [vmem:[%s2612_s19 + $0xe8] sm:$0xff]  ;;  %v400_v5 = vld [vmem:[%s2612_s19 + $0x110] sm:$0xff] }
  0x3a   : > { %v398_v6 = vld [vmem:[%s2612_s19 + $0x100] sm:$0xff]  ;;  %v401_v7 = vld [vmem:[%s2612_s19 + $0x118] sm:$0xff]  ;;  %v399_v8 = vld [vmem:[%s2612_s19 + $0x108] sm:$0xff] }
  0x3c   : > { %408 = vadd.xlane.f32.xlu1 %v372_v40  ;;  %406 = vadd.xlane.f32.xlu0 %v370_v41 }
  0x40   : > { %462 = vadd.xlane.f32.xlu1 %v373_v42  ;;  %460 = vadd.xlane.f32.xlu0 %v371_v43 }
  0x44   : > { %548 = vmax.xlane.f32.xlu1 %v369_v38  ;;  %546 = vmax.xlane.f32.xlu0 %v367_v36 }
  0x48   : > { %516 = vmax.xlane.f32.xlu1 %v372_v40  ;;  %514 = vmax.xlane.f32.xlu0 %v370_v41 }
  0x4c   : > { %412 = vadd.xlane.f32.xlu1 %v376_v44  ;;  %410 = vadd.xlane.f32.xlu0 %v374_v45 }
  0x50   : > { %466 = vadd.xlane.f32.xlu1 %v377_v46  ;;  %464 = vadd.xlane.f32.xlu0 %v375_v47 }
  0x54   : > { %552 = vmax.xlane.f32.xlu1 %v373_v42  ;;  %550 = vmax.xlane.f32.xlu0 %v371_v43 }
  0x58   : > { %520 = vmax.xlane.f32.xlu1 %v376_v44  ;;  %518 = vmax.xlane.f32.xlu0 %v374_v45 }
  0x5c   : > { %416 = vadd.xlane.f32.xlu1 %v380_v49  ;;  %414 = vadd.xlane.f32.xlu0 %v378_v50 }
  0x60   : > { %470 = vadd.xlane.f32.xlu1 %v381_v51  ;;  %468 = vadd.xlane.f32.xlu0 %v379_v52 }
  0x64   : > { %556 = vmax.xlane.f32.xlu1 %v377_v46  ;;  %554 = vmax.xlane.f32.xlu0 %v375_v47 }
  0x68   : > { %524 = vmax.xlane.f32.xlu1 %v380_v49  ;;  %522 = vmax.xlane.f32.xlu0 %v378_v50 }
  0x6c   : > { %420 = vadd.xlane.f32.xlu1 %v384_v53  ;;  %418 = vadd.xlane.f32.xlu0 %v382_v54 }
  0x70   : > { %474 = vadd.xlane.f32.xlu1 %v385_v55  ;;  %472 = vadd.xlane.f32.xlu0 %v383_v56 }
  0x74   : > { %560 = vmax.xlane.f32.xlu1 %v381_v51  ;;  %558 = vmax.xlane.f32.xlu0 %v379_v52 }
  0x78   : > { %528 = vmax.xlane.f32.xlu1 %v384_v53  ;;  %526 = vmax.xlane.f32.xlu0 %v382_v54 }
  0x7c   : > { %424 = vadd.xlane.f32.xlu1 %v388_v57  ;;  %422 = vadd.xlane.f32.xlu0 %v386_v58 }
  0x80   : > { %478 = vadd.xlane.f32.xlu1 %v389_v59  ;;  %476 = vadd.xlane.f32.xlu0 %v387_v60 }
  0x84   : > { %564 = vmax.xlane.f32.xlu1 %v385_v55  ;;  %562 = vmax.xlane.f32.xlu0 %v383_v56 }
  0x88   : > { %532 = vmax.xlane.f32.xlu1 %v388_v57  ;;  %530 = vmax.xlane.f32.xlu0 %v386_v58 }
  0x8c   : > { %428 = vadd.xlane.f32.xlu1 %v392_v61  ;;  %426 = vadd.xlane.f32.xlu0 %v390_v62 }
  0x90   : > { %482 = vadd.xlane.f32.xlu1 %v393_v63  ;;  %480 = vadd.xlane.f32.xlu0 %v391_v0 }
  0x94   : > { %568 = vmax.xlane.f32.xlu1 %v389_v59  ;;  %566 = vmax.xlane.f32.xlu0 %v387_v60 }
  0x98   : > { %536 = vmax.xlane.f32.xlu1 %v392_v61  ;;  %534 = vmax.xlane.f32.xlu0 %v390_v62 }
  0x9c   : > { %432 = vadd.xlane.f32.xlu1 %v396_v1  ;;  %430 = vadd.xlane.f32.xlu0 %v394_v2 }
  0xa0   : > { %486 = vadd.xlane.f32.xlu1 %v397_v3  ;;  %484 = vadd.xlane.f32.xlu0 %v395_v4 }
  0xa4   : > { %572 = vmax.xlane.f32.xlu1 %v393_v63  ;;  %570 = vmax.xlane.f32.xlu0 %v391_v0 }
  0xa8   : > { %540 = vmax.xlane.f32.xlu1 %v396_v1  ;;  %538 = vmax.xlane.f32.xlu0 %v394_v2 }
  0xac   : > { %436 = vadd.xlane.f32.xlu1 %v400_v5  ;;  %434 = vadd.xlane.f32.xlu0 %v398_v6 }
  0xb0   : > { %490 = vadd.xlane.f32.xlu1 %v401_v7  ;;  %488 = vadd.xlane.f32.xlu0 %v399_v8 }
  0xb4   : > { %576 = vmax.xlane.f32.xlu1 %v397_v3  ;;  %574 = vmax.xlane.f32.xlu0 %v395_v4 }
  0xb8   : > { %544 = vmax.xlane.f32.xlu1 %v400_v5  ;;  %542 = vmax.xlane.f32.xlu0 %v398_v6 }
  0xbc   : > { %580 = vmax.xlane.f32.xlu1 %v401_v7  ;;  %578 = vmax.xlane.f32.xlu0 %v399_v8 }
  0xbd   : > { %v457_v9 = vpop.xlane.xlu1 %456  ;;  %v403_v10 = vpop.xlane.xlu0 %402 }
  0xbe   : > { %v492_v19 = vmul.f32 0.0078125, %v457_v9  ;;  %v438_v20 = vmul.f32 0.0078125, %v403_v10 }
  0xc0   : > { %v583_v25 = vsel %vm582_vm0, %v438_v20, %v492_v19 }
  0xc1   : > { %v459_v11 = vpop.xlane.xlu1 %458  ;;  %v405_v12 = vpop.xlane.xlu0 %404 }
  0xc2   : > { %v493_v17 = vmul.f32 0.0078125, %v459_v11  ;;  %v439_v18 = vmul.f32 0.0078125, %v405_v12 }
  0xc4   : > { %v584_v24 = vsel %vm582_vm0, %v439_v18, %v493_v17 }
  0xc5   : > { %v513_v13 = vpop.xlane.xlu1 %512  ;;  %v511_v14 = vpop.xlane.xlu0 %510 }
  0xc6   : > { %v603_v26 = vsel %vm601_vm2, %v584_v24, %v513_v13  ;;  %v602_v27 = vsel %vm601_vm2, %v583_v25, %v511_v14 }
  0xc9   : > { %v409_v15 = vpop.xlane.xlu1 %408  ;;  %v407_v16 = vpop.xlane.xlu0 %406 }
  0xca   : > { %v441_v41 = vmul.f32 0.0078125, %v409_v15  ;;  %v440_v42 = vmul.f32 0.0078125, %v407_v16 }
  0xcd   : > { %v463_v21 = vpop.xlane.xlu1 %462  ;;  %v461_v22 = vpop.xlane.xlu0 %460 }
  0xce   : > { %v495_v37 = vmul.f32 0.0078125, %v463_v21  ;;  %v494_v38 = vmul.f32 0.0078125, %v461_v22 }
  0xd0   : > { %v586_v43 = vsel %vm582_vm0, %v441_v41, %v495_v37  ;;  %v585_v44 = vsel %vm582_vm0, %v440_v42, %v494_v38 }
  0xd1   : > { %v549_v28 = vpop.xlane.xlu1 %548  ;;  %v547_v29 = vpop.xlane.xlu0 %546 }
  0xd2   : > { %v622_v30 = vsel %vm620_vm3, %v603_v26, %v549_v28  ;;  %v621_v31 = vsel %vm620_vm3, %v602_v27, %v547_v29 }
  0xd3   : > { %v639_v32 = vpack.c.bf16 %v622_v30, %v621_v31 }
  0xd5   : > { %v517_v33 = vpop.xlane.xlu1 %516  ;;  %664 = vmatpush1.bf16.msra.mxu0 %v639_v32  ;;  %v515_v34 = vpop.xlane.xlu0 %514 }
  0xd6   : > { %665 = vmatprep.subr.bf16.mxu0 %v2445_v48  ;;  %v605_v45 = vsel %vm601_vm2, %v586_v43, %v517_v33  ;;  %v604_v46 = vsel %vm601_vm2, %v585_v44, %v515_v34 }
  0xd9   : > { %v413_v35 = vpop.xlane.xlu1 %412  ;;  %v411_v36 = vpop.xlane.xlu0 %410 }
  0xda   : > { %v443_v61 = vmul.f32 0.0078125, %v413_v35  ;;  %v442_v62 = vmul.f32 0.0078125, %v411_v36 }
  0xdd   : > { %v467_v39 = vpop.xlane.xlu1 %466  ;;  %v465_v40 = vpop.xlane.xlu0 %464 }
  0xde   : > { %v497_v57 = vmul.f32 0.0078125, %v467_v39  ;;  %v496_v58 = vmul.f32 0.0078125, %v465_v40 }
  0xe0   : > { %v588_v63 = vsel %vm582_vm0, %v443_v61, %v497_v57  ;;  %v587_v0 = vsel %vm582_vm0, %v442_v62, %v496_v58 }
  0xe1   : > { %v553_v47 = vpop.xlane.xlu1 %552  ;;  %v551_v49 = vpop.xlane.xlu0 %550 }
  0xe2   : > { %v624_v50 = vsel %vm620_vm3, %v605_v45, %v553_v47  ;;  %v623_v51 = vsel %vm620_vm3, %v604_v46, %v551_v49 }
  0xe3   : > { %v640_v52 = vpack.c.bf16 %v624_v50, %v623_v51 }
  0xe5   : > { %v521_v53 = vpop.xlane.xlu1 %520  ;;  %666 = vmatpush1.bf16.msra.mxu0 %v640_v52  ;;  %v519_v54 = vpop.xlane.xlu0 %518 }
  0xe6   : > { %667 = vmatprep.subr.bf16.mxu0 %v2445_v48  ;;  %v607_v1 = vsel %vm601_vm2, %v588_v63, %v521_v53  ;;  %v606_v2 = vsel %vm601_vm2, %v587_v0, %v519_v54 }
  0xe9   : > { %v417_v55 = vpop.xlane.xlu1 %416  ;;  %v415_v56 = vpop.xlane.xlu0 %414 }
  0xea   : > { %v445_v16 = vmul.f32 0.0078125, %v417_v55  ;;  %v444_v17 = vmul.f32 0.0078125, %v415_v56 }
  0xed   : > { %v471_v59 = vpop.xlane.xlu1 %470  ;;  %v469_v60 = vpop.xlane.xlu0 %468 }
  0xee   : > { %v499_v12 = vmul.f32 0.0078125, %v471_v59  ;;  %v498_v13 = vmul.f32 0.0078125, %v469_v60 }
  0xf0   : > { %v590_v18 = vsel %vm582_vm0, %v445_v16, %v499_v12  ;;  %v589_v19 = vsel %vm582_vm0, %v444_v17, %v498_v13 }
  0xf1   : > { %v557_v3 = vpop.xlane.xlu1 %556  ;;  %v555_v4 = vpop.xlane.xlu0 %554 }
  0xf2   : > { %v626_v5 = vsel %vm620_vm3, %v607_v1, %v557_v3  ;;  %v625_v6 = vsel %vm620_vm3, %v606_v2, %v555_v4 }
  0xf3   : > { %v641_v7 = vpack.c.bf16 %v626_v5, %v625_v6 }
  0xf5   : > { %v525_v8 = vpop.xlane.xlu1 %524  ;;  %668 = vmatpush1.bf16.msra.mxu0 %v641_v7  ;;  %v523_v9 = vpop.xlane.xlu0 %522 }
  0xf6   : > { %669 = vmatprep.subr.bf16.mxu0 %v2445_v48  ;;  %v609_v20 = vsel %vm601_vm2, %v590_v18, %v525_v8  ;;  %v608_v21 = vsel %vm601_vm2, %v589_v19, %v523_v9 }
  0xf9   : > { %v421_v10 = vpop.xlane.xlu1 %420  ;;  %v419_v11 = vpop.xlane.xlu0 %418 }
  0xfa   : > { %v447_v35 = vmul.f32 0.0078125, %v421_v10  ;;  %v446_v36 = vmul.f32 0.0078125, %v419_v11 }
  0xfd   : > { %v475_v14 = vpop.xlane.xlu1 %474  ;;  %v473_v15 = vpop.xlane.xlu0 %472 }
  0xfe   : > { %v501_v31 = vmul.f32 0.0078125, %v475_v14  ;;  %v500_v32 = vmul.f32 0.0078125, %v473_v15 }
 0x100   : > { %v592_v37 = vsel %vm582_vm0, %v447_v35, %v501_v31  ;;  %v591_v38 = vsel %vm582_vm0, %v446_v36, %v500_v32 }
 0x101   : > { %v561_v22 = vpop.xlane.xlu1 %560  ;;  %v559_v23 = vpop.xlane.xlu0 %558 }
 0x102   : > { %v628_v24 = vsel %vm620_vm3, %v609_v20, %v561_v22  ;;  %v627_v25 = vsel %vm620_vm3, %v608_v21, %v559_v23 }
 0x103   : > { %v642_v26 = vpack.c.bf16 %v628_v24, %v627_v25 }
 0x105   : > { %v529_v27 = vpop.xlane.xlu1 %528  ;;  %670 = vmatpush1.bf16.msra.mxu0 %v642_v26  ;;  %v527_v28 = vpop.xlane.xlu0 %526 }
 0x106   : > { %671 = vmatprep.subr.bf16.mxu0 %v2445_v48  ;;  %v611_v39 = vsel %vm601_vm2, %v592_v37, %v529_v27  ;;  %v610_v40 = vsel %vm601_vm2, %v591_v38, %v527_v28 }
 0x109   : > { %v425_v29 = vpop.xlane.xlu1 %424  ;;  %v423_v30 = vpop.xlane.xlu0 %422 }
 0x10a   : > { %v449_v55 = vmul.f32 0.0078125, %v425_v29  ;;  %v448_v56 = vmul.f32 0.0078125, %v423_v30 }
 0x10d   : > { %v479_v33 = vpop.xlane.xlu1 %478  ;;  %v477_v34 = vpop.xlane.xlu0 %476 }
 0x10e   : > { %v503_v51 = vmul.f32 0.0078125, %v479_v33  ;;  %v502_v52 = vmul.f32 0.0078125, %v477_v34 }
 0x110   : > { %v594_v57 = vsel %vm582_vm0, %v449_v55, %v503_v51  ;;  %v593_v58 = vsel %vm582_vm0, %v448_v56, %v502_v52  ;;  %v2280_v56 = vld [vmem:[%s3348_s1] ss:$8 sps:$4 sm:$0xff]  }
 0x111   : > { %v565_v41 = vpop.xlane.xlu1 %564  ;;  %v563_v42 = vpop.xlane.xlu0 %562 }
 0x112   : > { %v630_v43 = vsel %vm620_vm3, %v611_v39, %v565_v41  ;;  %v629_v44 = vsel %vm620_vm3, %v610_v40, %v563_v42 }
 0x113   : > { %v643_v45 = vpack.c.bf16 %v630_v43, %v629_v44 }
 0x115   : > { %v533_v46 = vpop.xlane.xlu1 %532  ;;  %672 = vmatpush1.bf16.msra.mxu0 %v643_v45  ;;  %v531_v47 = vpop.xlane.xlu0 %530 }
 0x116   : > { %673 = vmatprep.subr.bf16.mxu0 %v2445_v48  ;;  %v613_v59 = vsel %vm601_vm2, %v594_v57, %v533_v46  ;;  %v612_v60 = vsel %vm601_vm2, %v593_v58, %v531_v47  ;;  %v2446_v57 = vmov 0.0  }
 0x117   : > { %2230 = vmatprep.subr.bf16.mxu1 %v2446_v57  ;;  %2210 = vmatprep.mubr.msk.bf16.mxu1 %vm2447_vm4, %v2446_v57 }
 0x119   : > { %v429_v49 = vpop.xlane.xlu1 %428  ;;  %v427_v50 = vpop.xlane.xlu0 %426 }
 0x11a   : > { %v451_v10 = vmul.f32 0.0078125, %v429_v49  ;;  %v450_v11 = vmul.f32 0.0078125, %v427_v50 }
 0x11d   : > { %v483_v53 = vpop.xlane.xlu1 %482  ;;  %v481_v54 = vpop.xlane.xlu0 %480 }
 0x11e   : > { %v505_v6 = vmul.f32 0.0078125, %v483_v53  ;;  %v504_v7 = vmul.f32 0.0078125, %v481_v54 }
 0x120   : > { %v596_v12 = vsel %vm582_vm0, %v451_v10, %v505_v6  ;;  %v595_v13 = vsel %vm582_vm0, %v450_v11, %v504_v7  ;;  %v2289_v6 = vld [vmem:[%s3349_s2 + $0x30] sm:$0xff]   ;;  %v2288_v7 = vld [vmem:[%s3349_s2 + $0x18] sm:$0xff]  }
 0x121   : > { %v569_v61 = vpop.xlane.xlu1 %568  ;;  %v567_v62 = vpop.xlane.xlu0 %566 }
 0x122   : > { %v632_v63 = vsel %vm620_vm3, %v613_v59, %v569_v61  ;;  %v631_v0 = vsel %vm620_vm3, %v612_v60, %v567_v62 }
 0x123   : > { %v644_v1 = vpack.c.bf16 %v632_v63, %v631_v0 }
 0x125   : > { %v537_v2 = vpop.xlane.xlu1 %536  ;;  %674 = vmatpush1.bf16.msra.mxu0 %v644_v1  ;;  %v535_v3 = vpop.xlane.xlu0 %534  ;;  %v2283_v1 = vld [vmem:[%s3349_s2] sm:$0xff]  }
 0x126   : > { %675 = vmatprep.subr.bf16.mxu0 %v2445_v48  ;;  %v615_v14 = vsel %vm601_vm2, %v596_v12, %v537_v2  ;;  %v614_v15 = vsel %vm601_vm2, %v595_v13, %v535_v3  ;;  %v2285_v2 = vld [vmem:[%s3349_s2 + $0x20] sm:$0xff]   ;;  %v2284_v3 = vld [vmem:[%s3349_s2 + $0x8] sm:$0xff]  }
 0x129   : > { %v433_v4 = vpop.xlane.xlu1 %432  ;;  %v431_v5 = vpop.xlane.xlu0 %430 }
 0x12a   : > { %v453_v29 = vmul.f32 0.0078125, %v433_v4  ;;  %v452_v30 = vmul.f32 0.0078125, %v431_v5  ;;  %v2287_v4 = vld [vmem:[%s3349_s2 + $0x28] sm:$0xff]   ;;  %v2286_v5 = vld [vmem:[%s3349_s2 + $0x10] sm:$0xff]  }
 0x12d   : > { %v487_v8 = vpop.xlane.xlu1 %486  ;;  %v485_v9 = vpop.xlane.xlu0 %484 }
 0x12e   : > { %v507_v25 = vmul.f32 0.0078125, %v487_v8  ;;  %v506_v26 = vmul.f32 0.0078125, %v485_v9  ;;  %v2290_v8 = vld [vmem:[%s3349_s2 + $0x38] sm:$0xff]   ;;  %v2291_v9 = vld [vmem:[%s3349_s2 + $0x40] sm:$0xff]  }
 0x130   : > { %v598_v31 = vsel %vm582_vm0, %v453_v29, %v507_v25  ;;  %v597_v32 = vsel %vm582_vm0, %v452_v30, %v506_v26  ;;  %v2449_v26 = vmov 1  }
 0x131   : > { %v573_v16 = vpop.xlane.xlu1 %572  ;;  %v571_v17 = vpop.xlane.xlu0 %570  ;;  %2263 = vset.pattern.permute.xlu0 %v2449_v26 }
 0x132   : > { %v634_v18 = vsel %vm620_vm3, %v615_v14, %v573_v16  ;;  %v633_v19 = vsel %vm620_vm3, %v614_v15, %v571_v17 }
 0x133   : > { %v645_v20 = vpack.c.bf16 %v634_v18, %v633_v19 }
 0x135   : > { %v541_v21 = vpop.xlane.xlu1 %540  ;;  %676 = vmatpush1.bf16.msra.mxu0 %v645_v20  ;;  %v539_v22 = vpop.xlane.xlu0 %538 }
 0x136   : > { %677 = vmatprep.subr.bf16.mxu0 %v2445_v48  ;;  %v617_v33 = vsel %vm601_vm2, %v598_v31, %v541_v21  ;;  %v616_v34 = vsel %vm601_vm2, %v597_v32, %v539_v22 }
 0x139   : > { %v437_v23 = vpop.xlane.xlu1 %436  ;;  %v435_v24 = vpop.xlane.xlu0 %434 }
 0x13a   : > { %v455_v44 = vmul.f32 0.0078125, %v437_v23  ;;  %v454_v45 = vmul.f32 0.0078125, %v435_v24 }
 0x13d   : > { %v491_v27 = vpop.xlane.xlu1 %490  ;;  %v489_v28 = vpop.xlane.xlu0 %488 }
 0x13e   : > { %v509_v40 = vmul.f32 0.0078125, %v491_v27  ;;  %v508_v41 = vmul.f32 0.0078125, %v489_v28 }
 0x140   : > { %v600_v46 = vsel %vm582_vm0, %v455_v44, %v509_v40  ;;  %v599_v47 = vsel %vm582_vm0, %v454_v45, %v508_v41 }
 0x141   : > { %v577_v35 = vpop.xlane.xlu1 %576  ;;  %v575_v36 = vpop.xlane.xlu0 %574 }
 0x142   : > { %v636_v37 = vsel %vm620_vm3, %v617_v33, %v577_v35  ;;  %v635_v38 = vsel %vm620_vm3, %v616_v34, %v575_v36 }
 0x143   : > { %v646_v39 = vpack.c.bf16 %v636_v37, %v635_v38 }
 0x145   : > { %v545_v42 = vpop.xlane.xlu1 %544  ;;  %678 = vmatpush1.bf16.msra.mxu0 %v646_v39  ;;  %v543_v43 = vpop.xlane.xlu0 %542 }
 0x146   : > { %679 = vmatprep.subr.bf16.mxu0 %v2445_v48  ;;  %v619_v49 = vsel %vm601_vm2, %v600_v46, %v545_v42  ;;  %v618_v50 = vsel %vm601_vm2, %v599_v47, %v543_v43 }
 0x149   : > { %v581_v51 = vpop.xlane.xlu1 %580  ;;  %v579_v52 = vpop.xlane.xlu0 %578 }
 0x14a   : > { %v638_v53 = vsel %vm620_vm3, %v619_v49, %v581_v51  ;;  %v637_v54 = vsel %vm620_vm3, %v618_v50, %v579_v52 }
 0x14b   : > { %v647_v55 = vpack.c.bf16 %v638_v53, %v637_v54 }
 0x14d   : > { %680 = vmatpush1.bf16.msra.mxu0 %v647_v55 }
 0x14e   : > { %2192 = vmatprep.subr.bf16.mxu0 %v2446_v57 }
 0x150   : > { %696 = vmatmul.mubr.bf16.vlgmr.msra.gmra.mrb[0].mxu0 %v2280_v56 }
 0x151   : > { %2194 = vmatprep.mubr.msk.bf16.mxu0 %vm2447_vm4, %v2446_v57 }
 0x223   : > { %v697_v58 = vpop.f32.mrb[0].mxu0 }
 0x224   : > { %v699_v59 = vpop.f32.mrb[1].mxu0  ;;  %v704_v61 = vmax.f32 %v697_v58, 0.0 }
 0x225   : > { %v700_v60 = vpop.f32.mrb[2].mxu0 }
 0x226   : > { %v705_v62 = vmax.f32 %v700_v60, 0.0  ;;  %v702_v63 = vpop.f32.mrb[3].mxu0 }
 0x228   : > { %v724_v0 = vpack.c.bf16 %v705_v62, %v704_v61 }
 0x22a   : > { %2193 = vmatpush3.bf16.msra.mxu0 %v724_v0  ;;  %2231 = vmatpush3.bf16.msra.mxu1 %v724_v0 }
 0x22d   : > { %2195 = vmatmul.mubr.msk.bf16.vlgmr.msra.gmra.mrb[4].mxu0 %vm659_vm1, %v2283_v1  ;;  %2211 = vmatmul.mubr.msk.bf16.vlgmr.msra.gmra.mrb[0].mxu1 %vm659_vm1, %v2285_v2 }
 0x22e   : > { %2198 = vmatprep.mubr.msk.bf16.mxu0 %vm2447_vm4, %v2446_v57  ;;  %2214 = vmatprep.mubr.msk.bf16.mxu1 %vm2447_vm4, %v2446_v57 }
 0x235   : > { %2199 = vmatmul.mubr.msk.bf16.gmra.mrb[8].mxu0 %vm659_vm1, %v2284_v3  ;;  %2215 = vmatmul.mubr.msk.bf16.gmra.mrb[4].mxu1 %vm659_vm1, %v2287_v4 }
 0x236   : > { %2202 = vmatprep.mubr.msk.bf16.mxu0 %vm2447_vm4, %v2446_v57  ;;  %2218 = vmatprep.mubr.msk.bf16.mxu1 %vm2447_vm4, %v2446_v57 }
 0x23d   : > { %2203 = vmatmul.mubr.msk.bf16.gmra.mrb[12].mxu0 %vm659_vm1, %v2286_v5  ;;  %2219 = vmatmul.mubr.msk.bf16.gmra.mrb[8].mxu1 %vm659_vm1, %v2289_v6 }
 0x23e   : > { %2206 = vmatprep.mubr.msk.bf16.mxu0 %vm2447_vm4, %v2446_v57  ;;  %2222 = vmatprep.mubr.msk.bf16.mxu1 %vm2447_vm4, %v2446_v57 }
 0x245   : > { %2207 = vmatmul.mubr.msk.bf16.gmra.mrb[16].mxu0 %vm659_vm1, %v2288_v7  ;;  %2223 = vmatmul.mubr.msk.bf16.gmra.mrb[12].mxu1 %vm659_vm1, %v2290_v8 }
 0x246   : > { %2226 = vmatprep.mubr.msk.bf16.mxu1 %vm2447_vm4, %v2446_v57 }
 0x24d   : > { %2227 = vmatmul.mubr.msk.bf16.gmra.mrb[16].mxu1 %vm659_vm1, %v2291_v9 }
 0x24e   : > { %1748 = vmatprep.mubr.bf16.mxu1 %v2445_v48 }
 0x300   : > { %v831_v10 = vpop.f32.mrb[4].mxu0  ;;  %v2767_v11 = vpop.f32.mrb[0].mxu1 }
 0x301   : > { %920 = vrot.lane.b32.xlu0 %v831_v10, %s2448_s10  ;;  %v2196_v12 = vpop.f32.mrb[5].mxu0  ;;  %v2212_v13 = vpop.f32.mrb[1].mxu1 }
 0x302   : > { %v2770_v14 = vpop.f32.mrb[6].mxu0  ;;  %v2772_v15 = vpop.f32.mrb[2].mxu1 }
 0x303   : > { %922 = vrot.lane.b32.xlu1 %v2770_v14, %s2448_s10  ;;  %v2197_v16 = vpop.f32.mrb[7].mxu0  ;;  %v2213_v17 = vpop.f32.mrb[3].mxu1 }
 0x308   : > { %v2776_v18 = vpop.f32.mrb[8].mxu0  ;;  %v2778_v19 = vpop.f32.mrb[4].mxu1 }
 0x309   : > { %924 = vrot.lane.b32.xlu1 %v2776_v18, %s2448_s10  ;;  %v2200_v20 = vpop.f32.mrb[9].mxu0  ;;  %v2216_v21 = vpop.f32.mrb[5].mxu1 }
 0x30a   : > { %v2782_v22 = vpop.f32.mrb[10].mxu0  ;;  %v2784_v23 = vpop.f32.mrb[6].mxu1 }
 0x30b   : > { %v2201_v24 = vpop.f32.mrb[11].mxu0  ;;  %v2217_v25 = vpop.f32.mrb[7].mxu1 }
 0x30d   : > { %926 = vrot.lane.b32.xlu1 %v2782_v22, %s2448_s10 }
 0x310   : > { %v2789_v27 = vpop.f32.mrb[12].mxu0  ;;  %v2791_v28 = vpop.f32.mrb[8].mxu1 }
 0x311   : > { %928 = vrot.lane.b32.xlu0 %v2789_v27, %s2448_s10  ;;  %v2204_v29 = vpop.f32.mrb[13].mxu0  ;;  %v2220_v30 = vpop.f32.mrb[9].mxu1 }
 0x312   : > { %v2795_v31 = vpop.f32.mrb[14].mxu0  ;;  %v2797_v32 = vpop.f32.mrb[10].mxu1 }
 0x313   : > { %930 = vrot.lane.b32.xlu1 %v2795_v31, %s2448_s10  ;;  %v2205_v33 = vpop.f32.mrb[15].mxu0  ;;  %v2221_v34 = vpop.f32.mrb[11].mxu1 }
 0x318   : > { %v2801_v35 = vpop.f32.mrb[16].mxu0  ;;  %v2803_v36 = vpop.f32.mrb[12].mxu1 }
 0x319   : > { %932 = vrot.lane.b32.xlu0 %v2801_v35, %s2448_s10  ;;  %v2208_v37 = vpop.f32.mrb[17].mxu0  ;;  %v2224_v38 = vpop.f32.mrb[13].mxu1 }
 0x31a   : > { %v2807_v39 = vpop.f32.mrb[18].mxu0  ;;  %v2809_v40 = vpop.f32.mrb[14].mxu1 }
 0x31b   : > { %934 = vrot.lane.b32.xlu1 %v2807_v39, %s2448_s10  ;;  %v2209_v41 = vpop.f32.mrb[19].mxu0  ;;  %v2225_v42 = vpop.f32.mrb[15].mxu1 }
 0x31d   : > { %936 = vrot.lane.b32.xlu0 %v2767_v11, %s2448_s10 }
 0x31f   : > { %938 = vrot.lane.b32.xlu1 %v2772_v15, %s2448_s10 }
 0x320   : > { %v2817_v43 = vpop.f32.mrb[16].mxu1 }
 0x321   : > { %940 = vrot.lane.b32.xlu0 %v2778_v19, %s2448_s10  ;;  %v2228_v44 = vpop.f32.mrb[17].mxu1 }
 0x322   : > { %v2821_v45 = vpop.f32.mrb[18].mxu1 }
 0x323   : > { %942 = vrot.lane.b32.xlu1 %v2784_v23, %s2448_s10  ;;  %v2229_v46 = vpop.f32.mrb[19].mxu1 }
 0x325   : > { %944 = vrot.lane.b32.xlu0 %v2791_v28, %s2448_s10 }
 0x327   : > { %946 = vrot.lane.b32.xlu1 %v2797_v32, %s2448_s10 }
 0x329   : > { %948 = vrot.lane.b32.xlu0 %v2803_v36, %s2448_s10 }
 0x32b   : > { %950 = vrot.lane.b32.xlu1 %v2809_v40, %s2448_s10 }
 0x32d   : > { %952 = vrot.lane.b32.xlu0 %v2817_v43, %s2448_s10 }
 0x32f   : > { %954 = vrot.lane.b32.xlu1 %v2821_v45, %s2448_s10 }
 0x373   : > { %v921_v47 = vpop.permute.xlu0 %920 }
 0x374   : > { %v974_v49 = vadd.f32 %v921_v47, %v831_v10 }
 0x375   : > { %v923_v51 = vpop.permute.xlu1 %922 }
 0x376   : > { %v2128_v50 = vmul.f32 -1.442695, %v974_v49  ;;  %v975_v59 = vadd.f32 %v923_v51, %v2770_v14 }
 0x378   : > { %2313 = vpow2.f32 %v2128_v50  ;;  %v2129_v0 = vmul.f32 -1.442695, %v975_v59 }
 0x37b   : > { %v925_v52 = vpop.permute.xlu1 %924 }
 0x37c   : > { %v976_v4 = vadd.f32 %v925_v52, %v2776_v18 }
 0x37e   : > { %v2130_v7 = vmul.f32 -1.442695, %v976_v4 }
 0x37f   : > { %v927_v55 = vpop.permute.xlu1 %926 }
 0x380   : > { %v977_v9 = vadd.f32 %v927_v55, %v2782_v22 }
 0x382   : > { %v2314_v53 = vpop.eup %2313  ;;  %v2131_v16 = vmul.f32 -1.442695, %v977_v9 }
 0x383   : > { %v1046_v54 = vadd.f32 1.0, %v2314_v53  ;;  %v929_v56 = vpop.permute.xlu0 %928 }
 0x385   : > { %2315 = vrcp.f32 %v1046_v54  ;;  %v931_v57 = vpop.permute.xlu1 %930 }
 0x386   : > { %v979_v18 = vadd.f32 %v931_v57, %v2795_v31 }
 0x388   : > { %v2133_v24 = vmul.f32 -1.442695, %v979_v18 }
 0x38b   : > { %v933_v58 = vpop.permute.xlu0 %932 }
 0x38c   : > { %v980_v38 = vadd.f32 %v933_v58, %v2801_v35 }
 0x38d   : > { %v2838_v60 = vpop.permute.xlu1 %934 }
 0x38e   : > { %v2134_v47 = vmul.f32 -1.442695, %v980_v38  ;;  %v981_v9 = vadd.f32 %v2838_v60, %v2807_v39  ;;  %v1535_v38 = vld [vmem:[%s3353_s6] sm:$0xff] }
 0x38f   : > { %v2316_v61 = vpop.eup %2315  ;;  %v937_v62 = vpop.permute.xlu0 %936 }
 0x390   : > { %v982_v63 = vadd.f32 %v937_v62, %v2767_v11  ;;  %1218 = vperm.xlu0 %2263, %v2316_v61   ;;  %1102 = vperm.xlu1 %2264, %v2316_v61   ;;  %v978_v11 = vadd.f32 %v929_v56, %v2789_v27 }
 0x391   : > { %v939_v1 = vpop.permute.xlu1 %938 }
 0x392   : > { %v2136_v2 = vmul.f32 -1.442695, %v982_v63  ;;  %v983_v3 = vadd.f32 %v939_v1, %v2772_v15  ;;  %v2132_v17 = vmul.f32 -1.442695, %v978_v11 }
 0x393   : > { %v941_v6 = vpop.permute.xlu0 %940 }
 0x394   : > { %2317 = vpow2.f32 %v2136_v2  ;;  %v2137_v5 = vmul.f32 -1.442695, %v983_v3  ;;  %v984_v8 = vadd.f32 %v941_v6, %v2778_v19 }
 0x395   : > { %2319 = vpow2.f32 %v2129_v0  ;;  %v943_v13 = vpop.permute.xlu1 %942 }
 0x396   : > { %2321 = vpow2.f32 %v2137_v5  ;;  %v2138_v10 = vmul.f32 -1.442695, %v984_v8  ;;  %v985_v27 = vadd.f32 %v943_v13, %v2784_v23  ;;  %v2135_v13 = vmul.f32 -1.442695, %v981_v9 }
 0x397   : > { %2323 = vpow2.f32 %v2130_v7  ;;  %v945_v29 = vpop.permute.xlu0 %944 }
 0x398   : > { %2325 = vpow2.f32 %v2138_v10  ;;  %v2139_v31 = vmul.f32 -1.442695, %v985_v27  ;;  %v986_v55 = vadd.f32 %v945_v29, %v2791_v28 }
 0x399   : > { %v947_v19 = vpop.permute.xlu1 %946 }
 0x39a   : > { %v987_v30 = vadd.f32 %v947_v19, %v2797_v32  ;;  %v2140_v61 = vmul.f32 -1.442695, %v986_v55  ;;  %v1536_v55 = vld [vmem:[%s3353_s6 + $0x8] sm:$0xff] }
 0x39b   : > { %v949_v42 = vpop.permute.xlu0 %948 }
 0x39c   : > { %v2141_v41 = vmul.f32 -1.442695, %v987_v30  ;;  %v988_v32 = vadd.f32 %v949_v42, %v2803_v36 }
 0x39d   : > { %v2854_v56 = vpop.permute.xlu1 %950 }
 0x39e   : > { %v2318_v12 = vpop.eup %2317  ;;  %v2142_v52 = vmul.f32 -1.442695, %v988_v32  ;;  %v1547_v32 = vld [vmem:[%s3353_s6 + $0x60] sm:$0xff] }
 0x39f   : > { %v2320_v14 = vpop.eup %2319  ;;  %v1054_v15 = vadd.f32 1.0, %v2318_v12  ;;  %v953_v53 = vpop.permute.xlu0 %952 }
 0x3a0   : > { %v1047_v20 = vadd.f32 1.0, %v2320_v14  ;;  %v2322_v21 = vpop.eup %2321  ;;  %v990_v36 = vadd.f32 %v953_v53, %v2817_v43  ;;  %v1329_v53 = vld [vmem:[%s3351_s4 + $0x28] sm:$0xff] }
 0x3a1   : > { %2327 = vrcp.f32 %v1054_v15  ;;  %v2324_v22 = vpop.eup %2323  ;;  %v1055_v25 = vadd.f32 1.0, %v2322_v21  ;;  %v955_v0 = vpop.permute.xlu1 %954  ;;  %v989_v21 = vadd.f32 %v2854_v56, %v2809_v40  ;;  %v1326_v40 = vld [vmem:[%s3351_s4 + $0x10] sm:$0xff]  ;;  %v1538_v56 = vld [vmem:[%s3353_s6 + $0x18] sm:$0xff] }
 0x3a2   : > { %2329 = vpow2.f32 %v2131_v16  ;;  %v1048_v33 = vadd.f32 1.0, %v2324_v22  ;;  %v2326_v34 = vpop.eup %2325  ;;  %v2144_v63 = vmul.f32 -1.442695, %v990_v36  ;;  %v991_v4 = vadd.f32 %v955_v0, %v2821_v45  ;;  %v1540_v36 = vld [vmem:[%s3353_s6 + $0x28] sm:$0xff]  ;;  %v1546_v0 = vld [vmem:[%s3353_s6 + $0x58] sm:$0xff] }
 0x3a3   : > { %2331 = vpow2.f32 %v2132_v17  ;;  %v1056_v46 = vadd.f32 1.0, %v2326_v34  ;;  %v2143_v22 = vmul.f32 -1.442695, %v989_v21 }
 0x3a4   : > { %2333 = vrcp.f32 %v1047_v20  ;;  %v2145_v8 = vmul.f32 -1.442695, %v991_v4  ;;  %v2957_v4 = vld [vmem:[%s2612_s19] sm:$0xff] }
 0x3a5   : > { %2335 = vpow2.f32 %v2133_v24 }
 0x3a6   : > { %2337 = vrcp.f32 %v1055_v25 }
 0x3a7   : > { %2339 = vrcp.f32 %v1048_v33  ;;  %v1328_v33 = vld [vmem:[%s3351_s4 + $0x20] sm:$0xff] }
 0x3a8   : > { %2341 = vpow2.f32 %v2139_v31 }
 0x3a9   : > { %2343 = vpow2.f32 %v2141_v41  ;;  %v1537_v41 = vld [vmem:[%s3353_s6 + $0x10] sm:$0xff] }
 0x3aa   : > { %2345 = vrcp.f32 %v1056_v46  ;;  %v1541_v46 = vld [vmem:[%s3353_s6 + $0x30] sm:$0xff] }
 0x3ab   : > { %v2328_v37 = vpop.eup %2327  ;;  %2347 = vpow2.f32 %v2134_v47  ;;  %v1545_v47 = vld [vmem:[%s3353_s6 + $0x50] sm:$0xff] }
 0x3ac   : > { %1250 = vperm.xlu0 %2263, %v2328_v37   ;;  %1142 = vperm.xlu1 %2264, %v2328_v37   ;;  %v2330_v44 = vpop.eup %2329  ;;  %v1330_v37 = vld [vmem:[%s3351_s4 + $0x30] sm:$0xff] }
 0x3ad   : > { %v2332_v23 = vpop.eup %2331  ;;  %v1049_v50 = vadd.f32 1.0, %v2330_v44  ;;  %v1539_v44 = vld [vmem:[%s3353_s6 + $0x20] sm:$0xff] }
 0x3ae   : > { %v2334_v49 = vpop.eup %2333  ;;  %v1050_v35 = vadd.f32 1.0, %v2332_v23  ;;  %v1543_v23 = vld [vmem:[%s3353_s6 + $0x40] sm:$0xff] }
 0x3af   : > { %v2336_v51 = vpop.eup %2335  ;;  %2349 = vrcp.f32 %v1049_v50  ;;  %v2294_v50 = vld [vmem:[%s3350_s3 + $0x4] ss:$8 sps:$4 sm:$0xff]  }
 0x3b0   : > { %2266 = vset.pattern.permute.xlu0 %v2445_v48  ;;  %2265 = vset.pattern.permute.xlu1 %v2449_v26  ;;  %v2338_v54 = vpop.eup %2337  ;;  %2351 = vrcp.f32 %v1050_v35  ;;  %v1051_v58 = vadd.f32 1.0, %v2336_v51  ;;  %v1325_v35 = vld [vmem:[%s3351_s4 + $0x8] sm:$0xff]  ;;  %v1551_v51 = vld [vmem:[%s3353_s6 + $0x80] sm:$0xff] }
 0x3b1   : > { %1107 = vperm.xlu0 %2266, %v2334_v49   ;;  %1222 = vperm.xlu1 %2265, %v2334_v49   ;;  %v2340_v57 = vpop.eup %2339  ;;  %2353 = vpow2.f32 %v2142_v52  ;;  %v1324_v49 = vld [vmem:[%s3351_s4] sm:$0xff]  ;;  %v1327_v52 = vld [vmem:[%s3351_s4 + $0x18] sm:$0xff] }
 0x3b2   : > { %v2342_v59 = vpop.eup %2341  ;;  %2355 = vrcp.f32 %v1051_v58  ;;  %2154 = vmatprep.mubr.msk.bf16.mxu0 %vm659_vm1, %v2294_v50 }
 0x3b3   : > { %v2344_v62 = vpop.eup %2343  ;;  %v1057_v28 = vadd.f32 1.0, %v2342_v59  ;;  %2357 = vpow2.f32 %v2140_v61  ;;  %v1542_v59 = vld [vmem:[%s3353_s6 + $0x38] sm:$0xff] }
 0x3b4   : > { %v2346_v1 = vpop.eup %2345  ;;  %v1059_v2 = vadd.f32 1.0, %v2344_v62  ;;  %2359 = vpow2.f32 %v2144_v63  ;;  %v1544_v63 = vld [vmem:[%s3353_s6 + $0x48] sm:$0xff] }
 0x3b5   : > { %1147 = vperm.xlu0 %2266, %v2338_v54   ;;  %1254 = vperm.xlu1 %2265, %v2338_v54   ;;  %v2348_v3 = vpop.eup %2347  ;;  %2361 = vrcp.f32 %v1057_v28  ;;  %v1331_v54 = vld [vmem:[%s3351_s4 + $0x38] sm:$0xff] }
 0x3b6   : > { %v1052_v6 = vadd.f32 1.0, %v2348_v3  ;;  %2363 = vrcp.f32 %v1059_v2  ;;  %v2953_v2 = vld [vmem:[%s2612_s19 + $0x8] sm:$0xff] }
 0x3b8   : > { %2365 = vrcp.f32 %v1052_v6 }
 0x3b9   : > { %1112 = vperm.xlu0 %2266, %v2340_v57   ;;  %1226 = vperm.xlu1 %2265, %v2340_v57   ;;  %v2350_v43 = vpop.eup %2349  ;;  %2367 = vpow2.f32 %v2145_v8 }
 0x3ba   : > { %v2352_v5 = vpop.eup %2351 }
 0x3bb   : > { %v2354_v7 = vpop.eup %2353 }
 0x3bc   : > { %v1060_v10 = vadd.f32 1.0, %v2354_v7  ;;  %v2356_v45 = vpop.eup %2355  ;;  %v2965_v7 = vld [vmem:[%s2612_s19 + $0x18] sm:$0xff] }
 0x3bd   : > { %1152 = vperm.xlu0 %2266, %v2346_v1   ;;  %1258 = vperm.xlu1 %2265, %v2346_v1   ;;  %v2358_v11 = vpop.eup %2357 }
 0x3be   : > { %v2360_v12 = vpop.eup %2359  ;;  %2369 = vrcp.f32 %v1060_v10  ;;  %v1058_v15 = vadd.f32 1.0, %v2358_v11 }
 0x3bf   : > { %v2362_v14 = vpop.eup %2361  ;;  %2371 = vpow2.f32 %v2135_v13  ;;  %v1062_v39 = vadd.f32 1.0, %v2360_v12  ;;  %v1550_v12 = vld [vmem:[%s3353_s6 + $0x78] sm:$0xff] }
 0x3c0   : > { %v2364_v16 = vpop.eup %2363  ;;  %2373 = vrcp.f32 %v1058_v15 }
 0x3c1   : > { %2270 = vset.pattern.permute.xlu0 %v2449_v26  ;;  %1230 = vperm.xlu1 %2265, %v2350_v43   ;;  %2375 = vrcp.f32 %v1062_v39 }
 0x3c2   : > { %1234 = vperm.xlu0 %2270, %v2352_v5   ;;  %v2366_v60 = vpop.eup %2365 }
 0x3c3   : > { %v2368_v17 = vpop.eup %2367 }
 0x3c4   : > { %v1063_v20 = vadd.f32 1.0, %v2368_v17 }
 0x3c5   : > { %2267 = vset.pattern.permute.xlu1 %v2445_v48 }
 0x3c6   : > { %2272 = vset.pattern.permute.xlu0 %v2445_v48  ;;  %1117 = vperm.xlu1 %2267, %v2350_v43   ;;  %2377 = vrcp.f32 %v1063_v20 }
 0x3c7   : > { %1127 = vperm.xlu0 %2272, %v2356_v45   ;;  %2379 = vpow2.f32 %v2143_v22  ;;  %v2988_v22 = vld [vmem:[%s2612_s19 + $0x20] sm:$0xff] }
 0x3c8   : > { %v2370_v18 = vpop.eup %2369 }
 0x3c9   : > { %v2372_v19 = vpop.eup %2371 }
 0x3ca   : > { %2268 = vset.pattern.permute.xlu1 %v2449_v26  ;;  %v2374_v24 = vpop.eup %2373  ;;  %v1053_v25 = vadd.f32 1.0, %v2372_v19 }
 0x3cb   : > { %1262 = vperm.xlu1 %2268, %v2362_v14   ;;  %1167 = vperm.xlu0 %2272, %v2364_v16   ;;  %v2376_v27 = vpop.eup %2375 }
 0x3cc   : > { %2381 = vrcp.f32 %v1053_v25 }
 0x3cf   : > { %2269 = vset.pattern.permute.xlu1 %v2445_v48  ;;  %1132 = vperm.xlu0 %2272, %v2366_v60  }
 0x3d0   : > { %1157 = vperm.xlu1 %2269, %v2362_v14   ;;  %v2378_v29 = vpop.eup %2377  ;;  %v1552_v14 = vld [vmem:[%s3353_s6 + $0x88] sm:$0xff] }
 0x3d1   : > { %v2380_v30 = vpop.eup %2379 }
 0x3d2   : > { %v1061_v31 = vadd.f32 1.0, %v2380_v30 }
 0x3d3   : > { %1172 = vperm.xlu0 %2272, %v2370_v18  }
 0x3d4   : > { %1122 = vperm.xlu1 %2269, %v2352_v5   ;;  %2383 = vrcp.f32 %v1061_v31  ;;  %v2961_v5 = vld [vmem:[%s2612_s19 + $0x10] sm:$0xff] }
 0x3d6   : > { %v2382_v34 = vpop.eup %2381 }
 0x3d7   : > { %2275 = vset.pattern.permute.xlu0 %v2449_v26 }
 0x3d8   : > { %1162 = vperm.xlu1 %2269, %v2374_v24   ;;  %1266 = vperm.xlu0 %2275, %v2374_v24  }
 0x3dc   : > { %2271 = vset.pattern.permute.xlu1 %v2449_v26  ;;  %1282 = vperm.xlu0 %2275, %v2376_v27  }
 0x3dd   : > { %1238 = vperm.xlu1 %2271, %v2356_v45   ;;  %v1548_v45 = vld [vmem:[%s3353_s6 + $0x68] sm:$0xff] }
 0x3de   : > { %v2384_v42 = vpop.eup %2383 }
 0x3e0   : > { %2279 = vset.pattern.permute.xlu0 %v2445_v48 }
 0x3e1   : > { %1270 = vperm.xlu1 %2271, %v2364_v16   ;;  %1187 = vperm.xlu0 %2279, %v2378_v29  }
 0x3e5   : > { %1242 = vperm.xlu1 %2271, %v2366_v60   ;;  %1344 = vperm.xlu0 %2279, %v1326_v40   ;;  %v2980_v60 = vld [vmem:[%s2612_s19 + $0x28] sm:$0xff] }
 0x3e9   : > { %1246 = vperm.xlu1 %2271, %v2382_v34   ;;  %1354 = vperm.xlu0 %2279, %v1328_v33  }
 0x3ed   : > { %2273 = vset.pattern.permute.xlu1 %v2445_v48  ;;  %1364 = vperm.xlu0 %2279, %v1330_v37  }
 0x3ee   : > { %1137 = vperm.xlu1 %2273, %v2382_v34  }
 0x3f1   : > { %1555 = vperm.xlu0 %2279, %v1535_v38  }
 0x3f2   : > { %2274 = vset.pattern.permute.xlu1 %v2449_v26 }
 0x3f3   : > { %1274 = vperm.xlu1 %2274, %v2370_v18   ;;  %v2984_v18 = vld [vmem:[%s2612_s19 + $0x38] sm:$0xff] }
 0x3f5   : > { %1565 = vperm.xlu0 %2279, %v1537_v41  }
 0x3f7   : > { %1278 = vperm.xlu1 %2274, %v2384_v42  }
 0x3f9   : > { %1575 = vperm.xlu0 %2279, %v1539_v44  }
 0x3fb   : > { %2276 = vset.pattern.permute.xlu1 %v2445_v48 }
 0x3fc   : > { %1177 = vperm.xlu1 %2276, %v2384_v42   ;;  %v2998_v42 = vld [vmem:[%s2612_s19 + $0x40] sm:$0xff] }
 0x3fd   : > { %1585 = vperm.xlu0 %2279, %v1541_v46  }
 0x400   : > { %2277 = vset.pattern.permute.xlu1 %v2449_v26  ;;  %v1549_v26 = vld [vmem:[%s3353_s6 + $0x70] sm:$0xff] }
 0x401   : > { %1595 = vperm.xlu0 %2279, %v1543_v23   ;;  %1286 = vperm.xlu1 %2277, %v2378_v29   ;;  %v3002_v23 = vld [vmem:[%s2612_s19 + $0x48] sm:$0xff] }
 0x405   : > { %1605 = vperm.xlu0 %2279, %v1545_v47   ;;  %2278 = vset.pattern.permute.xlu1 %v2445_v48 }
 0x406   : > { %1182 = vperm.xlu1 %2278, %v2376_v27   ;;  %v2992_v27 = vld [vmem:[%s2612_s19 + $0x30] sm:$0xff] }
 0x409   : > { %1615 = vperm.xlu0 %2279, %v1547_v32   ;;  %v3006_v32 = vld [vmem:[%s2612_s19 + $0x58] sm:$0xff] }
 0x40a   : > { %1334 = vperm.xlu1 %2278, %v1324_v49  }
 0x40d   : > { %1625 = vperm.xlu0 %2279, %v1549_v26   ;;  %v3010_v26 = vld [vmem:[%s2612_s19 + $0x50] sm:$0xff] }
 0x40e   : > { %1339 = vperm.xlu1 %2278, %v1325_v35  }
 0x40f   : > { %v1219_v57 = vpop.permute.xlu0 %1218  ;;  %v1103_v58 = vpop.permute.xlu1 %1102 }
 0x410   : > { %v1289_v3 = vmul.f32 %v2953_v2, %v1219_v57  ;;  %v1190_v43 = vmul.f32 %v2957_v4, %v1103_v58  ;;  %v3018_v58 = vld [vmem:[%s2612_s19 + $0x78] sm:$0xff] }
 0x411   : > { %1635 = vperm.xlu0 %2279, %v1551_v51  }
 0x412   : > { %1349 = vperm.xlu1 %2278, %v1327_v52  }
 0x416   : > { %1359 = vperm.xlu1 %2278, %v1329_v53  }
 0x41a   : > { %1369 = vperm.xlu1 %2278, %v1331_v54  }
 0x41e   : > { %1560 = vperm.xlu1 %2278, %v1536_v55  }
 0x422   : > { %1570 = vperm.xlu1 %2278, %v1538_v56  }
 0x426   : > { %1580 = vperm.xlu1 %2278, %v1540_v36   ;;  %v3014_v36 = vld [vmem:[%s2612_s19 + $0x68] sm:$0xff] }
 0x42a   : > { %1590 = vperm.xlu1 %2278, %v1542_v59  }
 0x42b   : > { %v2942_v61 = vpop.permute.xlu0 %1250  ;;  %v2944_v62 = vpop.permute.xlu1 %1142 }
 0x42e   : > { %1600 = vperm.xlu1 %2278, %v1544_v63  }
 0x430   : > { %v1108_v28 = vpop.permute.xlu0 %1107  ;;  %v1223_v1 = vpop.permute.xlu1 %1222 }
 0x431   : > { %v1191_v6 = vmul.f32 %v2961_v5, %v1108_v28  ;;  %v1290_v8 = vmul.f32 %v2965_v7, %v1223_v1 }
 0x432   : > { %1610 = vperm.xlu1 %2278, %v1546_v0   ;;  %v3022_v0 = vld [vmem:[%s2612_s19 + $0x98] sm:$0xff] }
 0x433   : > { %v1208_v9 = vpack.c.bf16 %v1191_v6, %v1190_v43  ;;  %v1307_v10 = vpack.c.bf16 %v1290_v8, %v1289_v3  ;;  %v3026_v3 = vld [vmem:[%s2612_s19 + $0x60] sm:$0xff]  ;;  %v3030_v8 = vld [vmem:[%s2612_s19 + $0x70] sm:$0xff] }
 0x434   : > { %v1255_v11 = vpop.permute.xlu1 %1254  ;;  %v1148_v16 = vpop.permute.xlu0 %1147 }
 0x435   : > { %1420 = vmatprep.subr.bf16.mxu0 %v1307_v10  ;;  %v1298_v28 = vmul.f32 %v3022_v0, %v1255_v11  ;;  %v3034_v10 = vld [vmem:[%s2612_s19 + $0x88] sm:$0xff]  ;;  %v3039_v11 = vld [vmem:[%s2612_s19 + $0x90] sm:$0xff] }
 0x436   : > { %1620 = vperm.xlu1 %2278, %v1548_v45   ;;  %1421 = vmatpush1.bf16.msra.mxu0 %v1208_v9  ;;  %v1297_v45 = vmul.f32 %v3034_v10, %v2942_v61 }
 0x438   : > { %v1227_v13 = vpop.permute.xlu1 %1226  ;;  %v1113_v21 = vpop.permute.xlu0 %1112 }
 0x439   : > { %v1291_v17 = vmul.f32 %v2980_v60, %v1227_v13  ;;  %v1192_v25 = vmul.f32 %v2988_v22, %v1113_v21 }
 0x43a   : > { %1630 = vperm.xlu1 %2278, %v1550_v12   ;;  %v1199_v12 = vmul.f32 %v3039_v11, %v1148_v16 }
 0x43c   : > { %v2977_v15 = vpop.permute.xlu1 %1258  ;;  %v1153_v33 = vpop.permute.xlu0 %1152 }
 0x43e   : > { %1640 = vperm.xlu1 %2278, %v1552_v14   ;;  %v1311_v14 = vpack.c.bf16 %v1298_v28, %v1297_v45  ;;  %v3098_v45 = vld [vmem:[%s2612_s19 + $0x108] sm:$0xff] }
 0x440   : > { %v1231_v39 = vpop.permute.xlu1 %1230 }
 0x441   : > { %v1292_v20 = vmul.f32 %v2984_v18, %v1231_v39  ;;  %v1235_v37 = vpop.permute.xlu0 %1234  ;;  %v3043_v39 = vld [vmem:[%s2612_s19 + $0xb8] sm:$0xff] }
 0x442   : > { %v1293_v47 = vmul.f32 %v3002_v23, %v1235_v37  ;;  %v3065_v37 = vld [vmem:[%s2612_s19 + $0xa0] sm:$0xff] }
 0x443   : > { %v1308_v19 = vpack.c.bf16 %v1292_v20, %v1291_v17  ;;  %v3047_v20 = vld [vmem:[%s2612_s19 + $0x80] sm:$0xff] }
 0x444   : > { %v1198_v21 = vmul.f32 %v3047_v20, %v2944_v62  ;;  %v3061_v62 = vld [vmem:[%s2612_s19 + $0xd8] sm:$0xff] }
 0x445   : > { %1422 = vmatprep.subr.bf16.mxu0 %v1308_v19  ;;  %v1118_v24 = vpop.permute.xlu1 %1117  ;;  %v3052_v19 = vld [vmem:[%s2612_s19 + $0xa8] sm:$0xff] }
 0x446   : > { %v1193_v29 = vmul.f32 %v2992_v27, %v1118_v24  ;;  %v1128_v41 = vpop.permute.xlu0 %1127  ;;  %v1299_v16 = vmul.f32 %v3052_v19, %v2977_v15  ;;  %v1212_v24 = vpack.c.bf16 %v1199_v12, %v1198_v21  ;;  %v1200_v15 = vmul.f32 %v3065_v37, %v1153_v33 }
 0x447   : > { %v1195_v50 = vmul.f32 %v3010_v26, %v1128_v41 }
 0x448   : > { %v1209_v40 = vpack.c.bf16 %v1193_v29, %v1192_v25  ;;  %v3057_v25 = vld [vmem:[%s2612_s19 + $0xb0] sm:$0xff] }
 0x44a   : > { %1423 = vmatpush1.bf16.msra.mxu0 %v1209_v40  ;;  %v1263_v30 = vpop.permute.xlu1 %1262  ;;  %v1168_v53 = vpop.permute.xlu0 %1167 }
 0x44b   : > { %v1300_v17 = vmul.f32 %v3043_v39, %v1263_v30 }
 0x44d   : > { %v1312_v30 = vpack.c.bf16 %v1300_v17, %v1299_v16  ;;  %v3106_v16 = vld [vmem:[%s2612_s19 + $0x110] sm:$0xff] }
 0x44e   : > { %v1133_v55 = vpop.permute.xlu0 %1132 }
 0x44f   : > { %v1158_v34 = vpop.permute.xlu1 %1157  ;;  %v1196_v43 = vmul.f32 %v3026_v3, %v1133_v55 }
 0x450   : > { %v1201_v29 = vmul.f32 %v3057_v25, %v1158_v34 }
 0x452   : > { %v1173_v6 = vpop.permute.xlu0 %1172  ;;  %v1213_v34 = vpack.c.bf16 %v1201_v29, %v1200_v15  ;;  %v2297_v15 = vld [vmem:[%s3350_s3 + $0x10] ss:$8 sps:$4 sm:$0xff]  }
 0x453   : > { %v1123_v31 = vpop.permute.xlu1 %1122 }
 0x454   : > { %v1194_v44 = vmul.f32 %v2998_v42, %v1123_v31 }
 0x456   : > { %v1210_v51 = vpack.c.bf16 %v1195_v50, %v1194_v44  ;;  %v3069_v44 = vld [vmem:[%s2612_s19 + $0xc8] sm:$0xff] }
 0x457   : > { %v2995_v38 = vpop.permute.xlu1 %1162  ;;  %v1267_v40 = vpop.permute.xlu0 %1266 }
 0x45c   : > { %v1239_v46 = vpop.permute.xlu1 %1238 }
 0x45d   : > { %v1294_v49 = vmul.f32 %v3006_v32, %v1239_v46  ;;  %v1301_v46 = vmul.f32 %v3069_v44, %v1267_v40 }
 0x45f   : > { %v1309_v35 = vpack.c.bf16 %v1294_v49, %v1293_v47  ;;  %v3073_v47 = vld [vmem:[%s2612_s19 + $0xc0] sm:$0xff] }
 0x460   : > { %v1271_v52 = vpop.permute.xlu1 %1270  ;;  %v1202_v49 = vmul.f32 %v3073_v47, %v2995_v38 }
 0x461   : > { %1424 = vmatprep.subr.bf16.mxu0 %v1309_v35  ;;  %v1302_v31 = vmul.f32 %v3061_v62, %v1271_v52  ;;  %v3078_v35 = vld [vmem:[%s2612_s19 + $0xf8] sm:$0xff] }
 0x462   : > { %1425 = vmatpush1.bf16.msra.mxu0 %v1210_v51  ;;  %v3082_v51 = vld [vmem:[%s2612_s19 + $0xd0] sm:$0xff] }
 0x463   : > { %v1313_v50 = vpack.c.bf16 %v1302_v31, %v1301_v46  ;;  %v1203_v52 = vmul.f32 %v3082_v51, %v1168_v53  ;;  %v2295_v31 = vld [vmem:[%s3350_s3 + $0x14] ss:$8 sps:$4 sm:$0xff]   ;;  %v2300_v46 = vld [vmem:[%s3350_s3 + $0x20] ss:$8 sps:$4 sm:$0xff]  }
 0x464   : > { %v1243_v54 = vpop.permute.xlu1 %1242 }
 0x465   : > { %v1295_v57 = vmul.f32 %v3014_v36, %v1243_v54  ;;  %v3086_v54 = vld [vmem:[%s2612_s19 + $0xe8] sm:$0xff]  ;;  %v1214_v38 = vpack.c.bf16 %v1203_v52, %v1202_v49  ;;  %v2303_v49 = vld [vmem:[%s3350_s3 + $0x30] ss:$8 sps:$4 sm:$0xff]  }
 0x468   : > { %v1247_v56 = vpop.permute.xlu1 %1246 }
 0x469   : > { %v1296_v59 = vmul.f32 %v3018_v58, %v1247_v56 }
 0x46b   : > { %v1310_v63 = vpack.c.bf16 %v1296_v59, %v1295_v57  ;;  %v3090_v57 = vld [vmem:[%s2612_s19 + $0xf0] sm:$0xff] }
 0x46d   : > { %1426 = vmatprep.subr.bf16.mxu0 %v1310_v63  ;;  %v1138_v1 = vpop.permute.xlu1 %1137  ;;  %v1283_v63 = vpop.permute.xlu0 %1282 }
 0x46e   : > { %v1197_v9 = vmul.f32 %v3030_v8, %v1138_v1  ;;  %v3094_v1 = vld [vmem:[%s2612_s19 + $0xe0] sm:$0xff]  ;;  %v1305_v12 = vmul.f32 %v3098_v45, %v1283_v63 }
 0x46f   : > { %v1204_v53 = vmul.f32 %v3094_v1, %v1173_v6 }
 0x470   : > { %v1211_v13 = vpack.c.bf16 %v1197_v9, %v1196_v43 }
 0x471   : > { %v1188_v17 = vpop.permute.xlu0 %1187 }
 0x472   : > { %1427 = vmatpush1.bf16.msra.mxu0 %v1211_v13  ;;  %v1275_v61 = vpop.permute.xlu1 %1274  ;;  %v3102_v13 = vld [vmem:[%s2612_s19 + $0x118] sm:$0xff]  ;;  %v1207_v6 = vmul.f32 %v3106_v16, %v1188_v17 }
 0x473   : > { %1428 = vmatprep.subr.bf16.mxu0 %v1311_v14  ;;  %v1303_v55 = vmul.f32 %v3086_v54, %v1275_v61 }
 0x476   : > { %1429 = vmatpush1.bf16.msra.mxu0 %v1212_v24  ;;  %v1279_v41 = vpop.permute.xlu1 %1278  ;;  %v3110_v24 = vld [vmem:[%s2612_s19 + $0x100] sm:$0xff] }
 0x477   : > { %1430 = vmatprep.subr.bf16.mxu0 %v1312_v30  ;;  %v1304_v33 = vmul.f32 %v3078_v35, %v1279_v41  ;;  %v2292_v30 = vld [vmem:[%s3350_s3] ss:$8 sps:$4 sm:$0xff]   ;;  %v2298_v41 = vld [vmem:[%s3350_s3 + $0x24] ss:$8 sps:$4 sm:$0xff]  }
 0x479   : > { %v1314_v28 = vpack.c.bf16 %v1304_v33, %v1303_v55 }
 0x47a   : > { %1431 = vmatpush1.bf16.msra.mxu0 %v1213_v34  ;;  %v2301_v34 = vld [vmem:[%s3350_s3 + $0x34] ss:$8 sps:$4 sm:$0xff]  }
 0x47b   : > { %1432 = vmatprep.subr.bf16.mxu0 %v1313_v50  ;;  %v1178_v56 = vpop.permute.xlu1 %1177 }
 0x47c   : > { %v1205_v59 = vmul.f32 %v3090_v57, %v1178_v56 }
 0x47e   : > { %1433 = vmatpush1.bf16.msra.mxu0 %v1214_v38  ;;  %v1215_v43 = vpack.c.bf16 %v1205_v59, %v1204_v53 }
 0x47f   : > { %1434 = vmatprep.subr.bf16.mxu0 %v1314_v28 }
 0x480   : > { %v1287_v9 = vpop.permute.xlu1 %1286 }
 0x481   : > { %v1306_v14 = vmul.f32 %v3102_v13, %v1287_v9 }
 0x482   : > { %1435 = vmatpush1.bf16.msra.mxu0 %v1215_v43 }
 0x483   : > { %v1315_v21 = vpack.c.bf16 %v1306_v14, %v1305_v12 }
 0x485   : > { %1436 = vmatprep.subr.bf16.mxu0 %v1315_v21  ;;  %v1183_v61 = vpop.permute.xlu1 %1182  ;;  %v1345_v21 = vpop.permute.xlu0 %1344 }
 0x486   : > { %v1206_v29 = vmul.f32 %v3110_v24, %v1183_v61 }
 0x488   : > { %v1216_v40 = vpack.c.bf16 %v1207_v6, %v1206_v29 }
 0x489   : > { %v1335_v50 = vpop.permute.xlu1 %1334 }
 0x48a   : > { %1437 = vmatpush1.bf16.msra.mxu0 %v1216_v40 }
 0x48d   : > { %1453 = vmatmul.mubr.bf16.vlgmr.msra.gmra.mrb[20].mxu0 %v2292_v30  ;;  %v1340_v56 = vpop.permute.xlu1 %1339 }
 0x48e   : > { %2155 = vmatprep.mubr.msk.bf16.mxu0 %vm659_vm1, %v2295_v31 }
 0x491   : > { %v1350_v30 = vpop.permute.xlu1 %1349 }
 0x495   : > { %1463 = vmatmul.mubr.bf16.gmra.mrb[24].mxu0 %v2297_v15 }
 0x496   : > { %2156 = vmatprep.mubr.msk.bf16.mxu0 %vm659_vm1, %v2298_v41 }
 0x49d   : > { %1473 = vmatmul.mubr.bf16.gmra.mrb[28].mxu0 %v2300_v46 }
 0x49e   : > { %2157 = vmatprep.mubr.msk.bf16.mxu0 %vm659_vm1, %v2301_v34 }
 0x4a5   : > { %1483 = vmatmul.mubr.bf16.gmra.mrb[32].mxu0 %v2303_v49 }
 0x560   : > { %v1454_v33 = vpop.f32.mrb[20].mxu0 }
 0x561   : > { %v1455_v52 = vadd.f32 %v1454_v33, %v1335_v50  ;;  %v1456_v55 = vpop.f32.mrb[21].mxu0 }
 0x562   : > { %v1457_v38 = vadd.f32 %v1456_v55, %v1335_v50  ;;  %v1458_v59 = vpop.f32.mrb[22].mxu0 }
 0x563   : > { %v1459_v63 = vadd.f32 %v1458_v59, %v1340_v56  ;;  %v1460_v28 = vpop.f32.mrb[23].mxu0  ;;  %v1493_v43 = vmax.f32 %v1455_v52, 0.0 }
 0x564   : > { %v1461_v53 = vadd.f32 %v1460_v28, %v1340_v56  ;;  %v1494_v12 = vmax.f32 %v1457_v38, 0.0  ;;  %v1355_v56 = vpop.permute.xlu0 %1354 }
 0x565   : > { %v1495_v9 = vmax.f32 %v1459_v63, 0.0 }
 0x566   : > { %v1496_v14 = vmax.f32 %v1461_v53, 0.0  ;;  %v1360_v53 = vpop.permute.xlu1 %1359 }
 0x567   : > { %v1527_v17 = vpack.c.bf16 %v1495_v9, %v1493_v43 }
 0x568   : > { %v1528_v61 = vpack.c.bf16 %v1496_v14, %v1494_v12  ;;  %v1464_v6 = vpop.f32.mrb[24].mxu0 }
 0x569   : > { %v1465_v29 = vadd.f32 %v1464_v6, %v1345_v21  ;;  %v1466_v40 = vpop.f32.mrb[25].mxu0 }
 0x56a   : > { %v1467_v31 = vadd.f32 %v1466_v40, %v1345_v21  ;;  %v1468_v15 = vpop.f32.mrb[26].mxu0  ;;  %1716 = vmatprep.subr.bf16.mxu1 %v1528_v61 }
 0x56b   : > { %v1469_v41 = vadd.f32 %v1468_v15, %v1350_v30  ;;  %v1470_v46 = vpop.f32.mrb[27].mxu0  ;;  %1717 = vmatpush1.bf16.msra.mxu1 %v1527_v17  ;;  %v1497_v49 = vmax.f32 %v1465_v29, 0.0 }
 0x56c   : > { %v1471_v34 = vadd.f32 %v1470_v46, %v1350_v30  ;;  %v1498_v33 = vmax.f32 %v1467_v31, 0.0  ;;  %v1365_v30 = vpop.permute.xlu0 %1364 }
 0x56d   : > { %v1499_v50 = vmax.f32 %v1469_v41, 0.0 }
 0x56e   : > { %v1500_v52 = vmax.f32 %v1471_v34, 0.0  ;;  %v1370_v34 = vpop.permute.xlu1 %1369 }
 0x56f   : > { %v1529_v55 = vpack.c.bf16 %v1499_v50, %v1497_v49 }
 0x570   : > { %v1530_v38 = vpack.c.bf16 %v1500_v52, %v1498_v33  ;;  %v1474_v59 = vpop.f32.mrb[28].mxu0 }
 0x571   : > { %v1475_v63 = vadd.f32 %v1474_v59, %v1355_v56  ;;  %v1476_v28 = vpop.f32.mrb[29].mxu0 }
 0x572   : > { %v1477_v43 = vadd.f32 %v1476_v28, %v1355_v56  ;;  %v1478_v9 = vpop.f32.mrb[30].mxu0  ;;  %1718 = vmatprep.subr.bf16.mxu1 %v1530_v38 }
 0x573   : > { %v1479_v12 = vadd.f32 %v1478_v9, %v1360_v53  ;;  %v1480_v14 = vpop.f32.mrb[31].mxu0  ;;  %1719 = vmatpush1.bf16.msra.mxu1 %v1529_v55  ;;  %v1501_v17 = vmax.f32 %v1475_v63, 0.0  ;;  %v2305_v9 = vld [vmem:[%s3352_s5 + $0x8] sm:$0xff]  }
 0x574   : > { %v1481_v21 = vadd.f32 %v1480_v14, %v1360_v53  ;;  %v1502_v6 = vmax.f32 %v1477_v43, 0.0  ;;  %v2304_v43 = vld [vmem:[%s3352_s5] sm:$0xff]   ;;  %v2307_v14 = vld [vmem:[%s3352_s5 + $0x18] sm:$0xff]  }
 0x575   : > { %v1503_v61 = vmax.f32 %v1479_v12, 0.0  ;;  %v2306_v12 = vld [vmem:[%s3352_s5 + $0x10] sm:$0xff]  }
 0x576   : > { %v1504_v29 = vmax.f32 %v1481_v21, 0.0  ;;  %v2308_v21 = vld [vmem:[%s3352_s5 + $0x20] sm:$0xff]  }
 0x577   : > { %v1531_v40 = vpack.c.bf16 %v1503_v61, %v1501_v17  ;;  %v2309_v17 = vld [vmem:[%s3352_s5 + $0x28] sm:$0xff]   ;;  %v2310_v61 = vld [vmem:[%s3352_s5 + $0x30] sm:$0xff]  }
 0x578   : > { %v1532_v31 = vpack.c.bf16 %v1504_v29, %v1502_v6  ;;  %v1484_v15 = vpop.f32.mrb[32].mxu0  ;;  %v2311_v6 = vld [vmem:[%s3352_s5 + $0x38] sm:$0xff]   ;;  %v2312_v29 = vld [vmem:[%s3352_s5 + $0x40] sm:$0xff]  }
 0x579   : > { %v1485_v41 = vadd.f32 %v1484_v15, %v1365_v30  ;;  %v1486_v46 = vpop.f32.mrb[33].mxu0 }
 0x57a   : > { %v1487_v49 = vadd.f32 %v1486_v46, %v1365_v30  ;;  %v1488_v50 = vpop.f32.mrb[34].mxu0  ;;  %1720 = vmatprep.subr.bf16.mxu1 %v1532_v31 }
 0x57b   : > { %v1489_v33 = vadd.f32 %v1488_v50, %v1370_v34  ;;  %v1490_v52 = vpop.f32.mrb[35].mxu0  ;;  %1721 = vmatpush1.bf16.msra.mxu1 %v1531_v40  ;;  %v1505_v55 = vmax.f32 %v1485_v41, 0.0  ;;  %v1556_v40 = vpop.permute.xlu0 %1555 }
 0x57c   : > { %v1491_v56 = vadd.f32 %v1490_v52, %v1370_v34  ;;  %v1506_v59 = vmax.f32 %v1487_v49, 0.0  ;;  %v1561_v41 = vpop.permute.xlu1 %1560 }
 0x57d   : > { %v1507_v38 = vmax.f32 %v1489_v33, 0.0 }
 0x57e   : > { %v1508_v63 = vmax.f32 %v1491_v56, 0.0 }
 0x57f   : > { %v1533_v28 = vpack.c.bf16 %v1507_v38, %v1505_v55 }
 0x580   : > { %v1534_v53 = vpack.c.bf16 %v1508_v63, %v1506_v59 }
 0x582   : > { %1722 = vmatprep.subr.bf16.mxu1 %v1534_v53 }
 0x583   : > { %1723 = vmatpush1.bf16.msra.mxu1 %v1533_v28 }
 0x586   : > { %2167 = vmatmul.mubr.msk.bf16.vlgmr.msra.gmra.mrb[20].mxu1 %vm1688_vm5, %v2304_v43 }
 0x587   : > { %1758 = vmatprep.mubr.bf16.mxu1 %v2445_v48 }
 0x58e   : > { %2168 = vmatmul.mubr.msk.bf16.gmra.mrb[24].mxu1 %vm1688_vm5, %v2305_v9 }
 0x58f   : > { %1768 = vmatprep.mubr.bf16.mxu1 %v2445_v48 }
 0x596   : > { %2169 = vmatmul.mubr.msk.bf16.gmra.mrb[28].mxu1 %vm1688_vm5, %v2306_v12 }
 0x597   : > { %1778 = vmatprep.mubr.bf16.mxu1 %v2445_v48 }
 0x59e   : > { %2170 = vmatmul.mubr.msk.bf16.gmra.mrb[32].mxu1 %vm1688_vm5, %v2307_v14 }
 0x59f   : > { %1788 = vmatprep.mubr.bf16.mxu1 %v2445_v48 }
 0x5a6   : > { %2171 = vmatmul.mubr.msk.bf16.gmra.mrb[36].mxu1 %vm1688_vm5, %v2308_v21 }
 0x5a7   : > { %1798 = vmatprep.mubr.bf16.mxu1 %v2445_v48 }
 0x5ae   : > { %2172 = vmatmul.mubr.msk.bf16.gmra.mrb[40].mxu1 %vm1688_vm5, %v2309_v17 }
 0x5af   : > { %1808 = vmatprep.mubr.bf16.mxu1 %v2445_v48 }
 0x5b6   : > { %2173 = vmatmul.mubr.msk.bf16.gmra.mrb[44].mxu1 %vm1688_vm5, %v2310_v61 }
 0x5b7   : > { %1818 = vmatprep.mubr.bf16.mxu1 %v2445_v48 }
 0x5be   : > { %2174 = vmatmul.mubr.msk.bf16.gmra.mrb[48].mxu1 %vm1688_vm5, %v2311_v6 }
 0x5bf   : > { %1828 = vmatprep.mubr.bf16.mxu1 %v2445_v48 }
 0x5c6   : > { %2175 = vmatmul.mubr.msk.bf16.gmra.mrb[52].mxu1 %vm1688_vm5, %v2312_v29 }
 0x659   : > { %v1750_v30 = vpop.f32.mrb[20].mxu1 }
 0x65a   : > { %v1751_v31 = vadd.f32 %v1750_v30, %v1556_v40  ;;  %v1752_v15 = vpop.f32.mrb[21].mxu1 }
 0x65b   : > { %v1753_v46 = vadd.f32 %v1752_v15, %v1556_v40  ;;  %v1754_v34 = vpop.f32.mrb[22].mxu1 }
 0x65c   : > { %v1839_v49 = vadd.f32 %v2957_v4, %v1751_v31  ;;  %v1755_v50 = vadd.f32 %v1754_v34, %v1561_v41  ;;  %v1756_v33 = vpop.f32.mrb[23].mxu1  ;;  %v1566_v4 = vpop.permute.xlu0 %1565 }
 0x65d   : > { %v1840_v48 = vadd.f32 %v2953_v2, %v1753_v46  ;;  %v1757_v52 = vadd.f32 %v1756_v33, %v1561_v41 }
 0x65e   : > { %v1875_v56 = vmax.f32 %v1839_v49, 0.0  ;;  %v1841_v55 = vadd.f32 %v2961_v5, %v1755_v50  ;;  %v1571_v5 = vpop.permute.xlu1 %1570 }
 0x65f   : > { %v1876_v38 = vmax.f32 %v1840_v48, 0.0  ;;  %v1842_v59 = vadd.f32 %v2965_v7, %v1757_v52 }
 0x660   : > { %1911 = vst [vmem:[%s3186_s22] sm:$0xff] %v1875_v56  ;;  %v1877_v63 = vmax.f32 %v1841_v55, 0.0  ;;  %v1576_v15 = vpop.permute.xlu0 %1575 }
 0x661   : > { %1912 = vst [vmem:[%s3186_s22 + $0x8] sm:$0xff] %v1876_v38  ;;  %v1878_v28 = vmax.f32 %v1842_v59, 0.0  ;;  %v1760_v53 = vpop.f32.mrb[24].mxu1 }
 0x662   : > { %1913 = vst [vmem:[%s3186_s22 + $0x10] sm:$0xff] %v1877_v63  ;;  %v1761_v2 = vadd.f32 %v1760_v53, %v1566_v4  ;;  %v1762_v43 = vpop.f32.mrb[25].mxu1  ;;  %v1581_v49 = vpop.permute.xlu1 %1580 }
 0x663   : > { %1914 = vst [vmem:[%s3186_s22 + $0x18] sm:$0xff] %v1878_v28  ;;  %v1763_v7 = vadd.f32 %v1762_v43, %v1566_v4  ;;  %v1764_v9 = vpop.f32.mrb[26].mxu1 }
 0x664   : > { %v1843_v12 = vadd.f32 %v2988_v22, %v1761_v2  ;;  %v1765_v14 = vadd.f32 %v1764_v9, %v1571_v5  ;;  %v1766_v21 = vpop.f32.mrb[27].mxu1  ;;  %v1586_v4 = vpop.permute.xlu0 %1585 }
 0x665   : > { %v1844_v17 = vadd.f32 %v2980_v60, %v1763_v7  ;;  %v1767_v61 = vadd.f32 %v1766_v21, %v1571_v5 }
 0x666   : > { %v1879_v6 = vmax.f32 %v1843_v12, 0.0  ;;  %v1845_v29 = vadd.f32 %v2992_v27, %v1765_v14  ;;  %v1591_v43 = vpop.permute.xlu1 %1590 }
 0x667   : > { %v1880_v40 = vmax.f32 %v1844_v17, 0.0  ;;  %v1846_v30 = vadd.f32 %v2984_v18, %v1767_v61 }
 0x668   : > { %1915 = vst [vmem:[%s3186_s22 + $0x20] sm:$0xff] %v1879_v6  ;;  %v1881_v31 = vmax.f32 %v1845_v29, 0.0  ;;  %v1596_v29 = vpop.permute.xlu0 %1595 }
 0x669   : > { %1916 = vst [vmem:[%s3186_s22 + $0x28] sm:$0xff] %v1880_v40  ;;  %v1882_v41 = vmax.f32 %v1846_v30, 0.0  ;;  %v1770_v46 = vpop.f32.mrb[28].mxu1 }
 0x66a   : > { %1917 = vst [vmem:[%s3186_s22 + $0x30] sm:$0xff] %v1881_v31  ;;  %v1771_v22 = vadd.f32 %v1770_v46, %v1576_v15  ;;  %v1772_v34 = vpop.f32.mrb[29].mxu1 }
 0x66b   : > { %1918 = vst [vmem:[%s3186_s22 + $0x38] sm:$0xff] %v1882_v41  ;;  %v1773_v60 = vadd.f32 %v1772_v34, %v1576_v15  ;;  %v1774_v50 = vpop.f32.mrb[30].mxu1  ;;  %v1601_v15 = vpop.permute.xlu1 %1600 }
 0x66c   : > { %v1847_v27 = vadd.f32 %v2998_v42, %v1771_v22  ;;  %v1775_v33 = vadd.f32 %v1774_v50, %v1581_v49  ;;  %v1776_v18 = vpop.f32.mrb[31].mxu1 }
 0x66d   : > { %v1848_v48 = vadd.f32 %v3002_v23, %v1773_v60  ;;  %v1777_v52 = vadd.f32 %v1776_v18, %v1581_v49  ;;  %v1606_v18 = vpop.permute.xlu0 %1605 }
 0x66e   : > { %v1883_v56 = vmax.f32 %v1847_v27, 0.0  ;;  %v1849_v55 = vadd.f32 %v3010_v26, %v1775_v33 }
 0x66f   : > { %v1884_v38 = vmax.f32 %v1848_v48, 0.0  ;;  %v1850_v59 = vadd.f32 %v3006_v32, %v1777_v52 }
 0x670   : > { %1919 = vst [vmem:[%s3186_s22 + $0x40] sm:$0xff] %v1883_v56  ;;  %v1885_v63 = vmax.f32 %v1849_v55, 0.0  ;;  %v1611_v55 = vpop.permute.xlu1 %1610 }
 0x671   : > { %1920 = vst [vmem:[%s3186_s22 + $0x48] sm:$0xff] %v1884_v38  ;;  %v1886_v28 = vmax.f32 %v1850_v59, 0.0  ;;  %v1780_v53 = vpop.f32.mrb[32].mxu1 }
 0x672   : > { %1921 = vst [vmem:[%s3186_s22 + $0x50] sm:$0xff] %v1885_v63  ;;  %v1781_v42 = vadd.f32 %v1780_v53, %v1586_v4  ;;  %v1782_v2 = vpop.f32.mrb[33].mxu1 }
 0x673   : > { %1922 = vst [vmem:[%s3186_s22 + $0x58] sm:$0xff] %v1886_v28  ;;  %v1783_v23 = vadd.f32 %v1782_v2, %v1586_v4  ;;  %v1784_v5 = vpop.f32.mrb[34].mxu1 }
 0x674   : > { %v1851_v26 = vadd.f32 %v3026_v3, %v1781_v42  ;;  %v1785_v7 = vadd.f32 %v1784_v5, %v1591_v43  ;;  %v1786_v32 = vpop.f32.mrb[35].mxu1 }
 0x675   : > { %v1852_v9 = vadd.f32 %v3014_v36, %v1783_v23  ;;  %v1787_v12 = vadd.f32 %v1786_v32, %v1591_v43  ;;  %v1616_v23 = vpop.permute.xlu0 %1615  ;;  %v1621_v32 = vpop.permute.xlu1 %1620 }
 0x676   : > { %v1887_v14 = vmax.f32 %v1851_v26, 0.0  ;;  %v1853_v21 = vadd.f32 %v3030_v8, %v1785_v7 }
 0x677   : > { %v1888_v17 = vmax.f32 %v1852_v9, 0.0  ;;  %v1854_v61 = vadd.f32 %v3018_v58, %v1787_v12 }
 0x678   : > { %1923 = vst [vmem:[%s3186_s22 + $0x60] sm:$0xff] %v1887_v14  ;;  %v1889_v6 = vmax.f32 %v1853_v21, 0.0 }
 0x679   : > { %1924 = vst [vmem:[%s3186_s22 + $0x68] sm:$0xff] %v1888_v17  ;;  %v1890_v40 = vmax.f32 %v1854_v61, 0.0  ;;  %v1790_v30 = vpop.f32.mrb[36].mxu1 }
 0x67a   : > { %1925 = vst [vmem:[%s3186_s22 + $0x70] sm:$0xff] %v1889_v6  ;;  %v1791_v3 = vadd.f32 %v1790_v30, %v1596_v29  ;;  %v1792_v31 = vpop.f32.mrb[37].mxu1  ;;  %v1626_v30 = vpop.permute.xlu0 %1625 }
 0x67b   : > { %1926 = vst [vmem:[%s3186_s22 + $0x78] sm:$0xff] %v1890_v40  ;;  %v1793_v36 = vadd.f32 %v1792_v31, %v1596_v29  ;;  %v1794_v41 = vpop.f32.mrb[38].mxu1 }
 0x67c   : > { %v1855_v8 = vadd.f32 %v3047_v20, %v1791_v3  ;;  %v1795_v46 = vadd.f32 %v1794_v41, %v1601_v15  ;;  %v1796_v58 = vpop.f32.mrb[39].mxu1 }
 0x67d   : > { %v1856_v22 = vadd.f32 %v3034_v10, %v1793_v36  ;;  %v1797_v34 = vadd.f32 %v1796_v58, %v1601_v15  ;;  %v1631_v36 = vpop.permute.xlu1 %1630 }
 0x67e   : > { %v1891_v49 = vmax.f32 %v1855_v8, 0.0  ;;  %v1857_v60 = vadd.f32 %v3039_v11, %v1795_v46 }
 0x67f   : > { %v1892_v50 = vmax.f32 %v1856_v22, 0.0  ;;  %v1858_v27 = vadd.f32 %v3022_v0, %v1797_v34 }
 0x680   : > { %1927 = vst [vmem:[%s3186_s22 + $0x80] sm:$0xff] %v1891_v49  ;;  %v1893_v33 = vmax.f32 %v1857_v60, 0.0 }
 0x681   : > { %1928 = vst [vmem:[%s3186_s22 + $0x88] sm:$0xff] %v1892_v50  ;;  %v1894_v48 = vmax.f32 %v1858_v27, 0.0  ;;  %v1800_v52 = vpop.f32.mrb[40].mxu1  ;;  %v1636_v27 = vpop.permute.xlu0 %1635 }
 0x682   : > { %1929 = vst [vmem:[%s3186_s22 + $0x90] sm:$0xff] %v1893_v33  ;;  %v1801_v20 = vadd.f32 %v1800_v52, %v1606_v18  ;;  %v1802_v56 = vpop.f32.mrb[41].mxu1 }
 0x683   : > { %1930 = vst [vmem:[%s3186_s22 + $0x98] sm:$0xff] %v1894_v48  ;;  %v1803_v10 = vadd.f32 %v1802_v56, %v1606_v18  ;;  %v1804_v38 = vpop.f32.mrb[42].mxu1 }
 0x684   : > { %v1859_v11 = vadd.f32 %v3065_v37, %v1801_v20  ;;  %v1805_v59 = vadd.f32 %v1804_v38, %v1611_v55  ;;  %v1806_v0 = vpop.f32.mrb[43].mxu1 }
 0x685   : > { %v1860_v63 = vadd.f32 %v3052_v19, %v1803_v10  ;;  %v1807_v4 = vadd.f32 %v1806_v0, %v1611_v55 }
 0x686   : > { %v1895_v28 = vmax.f32 %v1859_v11, 0.0  ;;  %v1861_v53 = vadd.f32 %v3057_v25, %v1805_v59 }
 0x687   : > { %v1896_v42 = vmax.f32 %v1860_v63, 0.0  ;;  %v1862_v2 = vadd.f32 %v3043_v39, %v1807_v4 }
 0x688   : > { %1931 = vst [vmem:[%s3186_s22 + $0xa0] sm:$0xff] %v1895_v28  ;;  %v1897_v43 = vmax.f32 %v1861_v53, 0.0  ;;  %v1977_v28 = vld [vmem:[%s3186_s22 + $0x20] sm:$0xff] (%p2520_p5)  ;;  %v1979_v53 = vld [vmem:[%s3186_s22 + $0x28] sm:$0xff] (%p2520_p5) }
 0x689   : > { %1932 = vst [vmem:[%s3186_s22 + $0xa8] sm:$0xff] %v1896_v42  ;;  %v1898_v5 = vmax.f32 %v1862_v2, 0.0  ;;  %v1810_v26 = vpop.f32.mrb[44].mxu1  ;;  %1978 = vst [vmem:[%s3266_s9 + $0x40] sm:$0xff] (%p2520_p5), %v1977_v28  ;;  %v1981_v42 = vld [vmem:[%s3186_s22 + $0x30] sm:$0xff] (%p2520_p5)  ;;  %v1983_v2 = vld [vmem:[%s3186_s22 + $0x38] sm:$0xff] (%p2520_p5) }
 0x68a   : > { %1933 = vst [vmem:[%s3186_s22 + $0xb0] sm:$0xff] %v1897_v43  ;;  %v1811_v37 = vadd.f32 %v1810_v26, %v1616_v23  ;;  %v1812_v7 = vpop.f32.mrb[45].mxu1  ;;  %1980 = vst [vmem:[%s3266_s9 + $0x48] sm:$0xff] (%p2520_p5), %v1979_v53  ;;  %v1985_v43 = vld [vmem:[%s3186_s22 + $0x40] sm:$0xff] (%p2520_p5)  ;;  %v1991_v26 = vld [vmem:[%s3186_s22 + $0x58] sm:$0xff] (%p2520_p5) }
 0x68b   : > { %1934 = vst [vmem:[%s3186_s22 + $0xb8] sm:$0xff] %v1898_v5  ;;  %v1813_v19 = vadd.f32 %v1812_v7, %v1616_v23  ;;  %v1814_v9 = vpop.f32.mrb[46].mxu1  ;;  %1982 = vst [vmem:[%s3266_s9 + $0x60] sm:$0xff] (%p2520_p5), %v1981_v42  ;;  %v1987_v23 = vld [vmem:[%s3186_s22 + $0x48] sm:$0xff] (%p2520_p5)  ;;  %v1989_v5 = vld [vmem:[%s3186_s22 + $0x50] sm:$0xff] (%p2520_p5) }
 0x68c   : > { %v1863_v25 = vadd.f32 %v3073_v47, %v1811_v37  ;;  %v1815_v12 = vadd.f32 %v1814_v9, %v1621_v32  ;;  %v1816_v39 = vpop.f32.mrb[47].mxu1  ;;  %1984 = vst [vmem:[%s3266_s9 + $0x68] sm:$0xff] (%p2520_p5), %v1983_v2  ;;  %1986 = vst [vmem:[%s3266_s9 + $0x80] sm:$0xff] (%p2520_p5), %v1985_v43  ;;  %v1993_v37 = vld [vmem:[%s3186_s22 + $0x60] sm:$0xff] (%p2520_p5)  ;;  %v1995_v7 = vld [vmem:[%s3186_s22 + $0x68] sm:$0xff] (%p2520_p5) }
 0x68d   : > { %v1864_v14 = vadd.f32 %v3069_v44, %v1813_v19  ;;  %v1817_v21 = vadd.f32 %v1816_v39, %v1621_v32  ;;  %1988 = vst [vmem:[%s3266_s9 + $0x88] sm:$0xff] (%p2520_p5), %v1987_v23  ;;  %1990 = vst [vmem:[%s3266_s9 + $0xa0] sm:$0xff] (%p2520_p5), %v1989_v5  ;;  %v1997_v32 = vld [vmem:[%s3186_s22 + $0x70] sm:$0xff] (%p2520_p5)  ;;  %v1999_v19 = vld [vmem:[%s3186_s22 + $0x78] sm:$0xff] (%p2520_p5) }
 0x68e   : > { %v1899_v17 = vmax.f32 %v1863_v25, 0.0  ;;  %v1865_v61 = vadd.f32 %v3082_v51, %v1815_v12  ;;  %1992 = vst [vmem:[%s3266_s9 + $0xa8] sm:$0xff] (%p2520_p5), %v1991_v26  ;;  %1994 = vst [vmem:[%s3266_s9 + $0xc0] sm:$0xff] (%p2520_p5), %v1993_v37  ;;  %v2001_v9 = vld [vmem:[%s3186_s22 + $0x80] sm:$0xff] (%p2520_p5)  ;;  %v2003_v25 = vld [vmem:[%s3186_s22 + $0x88] sm:$0xff] (%p2520_p5) }
 0x68f   : > { %v1900_v6 = vmax.f32 %v1864_v14, 0.0  ;;  %v1866_v29 = vadd.f32 %v3061_v62, %v1817_v21  ;;  %1996 = vst [vmem:[%s3266_s9 + $0xc8] sm:$0xff] (%p2520_p5), %v1995_v7  ;;  %1998 = vst [vmem:[%s3266_s9 + $0xe0] sm:$0xff] (%p2520_p5), %v1997_v32  ;;  %v2005_v12 = vld [vmem:[%s3186_s22 + $0x90] sm:$0xff] (%p2520_p5)  ;;  %v2007_v39 = vld [vmem:[%s3186_s22 + $0x98] sm:$0xff] (%p2520_p5) }
 0x690   : > { %1935 = vst [vmem:[%s3186_s22 + $0xc0] sm:$0xff] %v1899_v17  ;;  %v1901_v40 = vmax.f32 %v1865_v61, 0.0  ;;  %2000 = vst [vmem:[%s3266_s9 + $0xe8] sm:$0xff] (%p2520_p5), %v1999_v19  ;;  %v2009_v14 = vld [vmem:[%s3186_s22 + $0xa0] sm:$0xff] (%p2520_p5)  ;;  %v2011_v21 = vld [vmem:[%s3186_s22 + $0xa8] sm:$0xff] (%p2520_p5) }
 0x691   : > { %1936 = vst [vmem:[%s3186_s22 + $0xc8] sm:$0xff] %v1900_v6  ;;  %v1902_v3 = vmax.f32 %v1866_v29, 0.0  ;;  %v1820_v31 = vpop.f32.mrb[48].mxu1  ;;  %2002 = vst [vmem:[%s3266_s9 + $0x100] sm:$0xff] (%p2520_p5), %v2001_v9  ;;  %v2013_v17 = vld [vmem:[%s3186_s22 + $0xb0] sm:$0xff] (%p2520_p5) }
 0x692   : > { %1937 = vst [vmem:[%s3186_s22 + $0xd0] sm:$0xff] %v1901_v40  ;;  %v1821_v47 = vadd.f32 %v1820_v31, %v1626_v30  ;;  %v1822_v15 = vpop.f32.mrb[49].mxu1  ;;  %2004 = vst [vmem:[%s3266_s9 + $0x108] sm:$0xff] (%p2520_p5), %v2003_v25  ;;  %v2015_v61 = vld [vmem:[%s3186_s22 + $0xb8] sm:$0xff] (%p2520_p5) }
 0x693   : > { %1938 = vst [vmem:[%s3186_s22 + $0xd8] sm:$0xff] %v1902_v3  ;;  %v1823_v44 = vadd.f32 %v1822_v15, %v1626_v30  ;;  %v1824_v41 = vpop.f32.mrb[50].mxu1  ;;  %2006 = vst [vmem:[%s3266_s9 + $0x120] sm:$0xff] (%p2520_p5), %v2005_v12 }
 0x694   : > { %v1867_v51 = vadd.f32 %v3094_v1, %v1821_v47  ;;  %v1825_v8 = vadd.f32 %v1824_v41, %v1631_v36  ;;  %v1826_v62 = vpop.f32.mrb[51].mxu1  ;;  %2008 = vst [vmem:[%s3266_s9 + $0x128] sm:$0xff] (%p2520_p5), %v2007_v39  ;;  %2010 = vst [vmem:[%s3266_s9 + $0x140] sm:$0xff] (%p2520_p5), %v2009_v14 }
 0x695   : > { %v1868_v46 = vadd.f32 %v3086_v54, %v1823_v44  ;;  %v1827_v58 = vadd.f32 %v1826_v62, %v1631_v36  ;;  %v1641_v54 = vpop.permute.xlu1 %1640  ;;  %2012 = vst [vmem:[%s3266_s9 + $0x148] sm:$0xff] (%p2520_p5), %v2011_v21  ;;  %2014 = vst [vmem:[%s3266_s9 + $0x160] sm:$0xff] (%p2520_p5), %v2013_v17 }
 0x696   : > { %v1903_v22 = vmax.f32 %v1867_v51, 0.0  ;;  %v1869_v34 = vadd.f32 %v3090_v57, %v1825_v8  ;;  %2016 = vst [vmem:[%s3266_s9 + $0x168] sm:$0xff] (%p2520_p5), %v2015_v61 }
 0x697   : > { %v1904_v49 = vmax.f32 %v1868_v46, 0.0  ;;  %v1870_v60 = vadd.f32 %v3078_v35, %v1827_v58  ;;  %v2017_v6 = vld [vmem:[%s3186_s22 + $0xc0] sm:$0xff] (%p2520_p5) }
 0x698   : > { %1939 = vst [vmem:[%s3186_s22 + $0xe0] sm:$0xff] %v1903_v22  ;;  %v1905_v50 = vmax.f32 %v1869_v34, 0.0  ;;  %v2019_v29 = vld [vmem:[%s3186_s22 + $0xc8] sm:$0xff] (%p2520_p5)  ;;  %2018 = vst [vmem:[%s3266_s9 + $0x180] sm:$0xff] (%p2520_p5), %v2017_v6 }
 0x699   : > { %1940 = vst [vmem:[%s3186_s22 + $0xe8] sm:$0xff] %v1904_v49  ;;  %v1906_v33 = vmax.f32 %v1870_v60, 0.0  ;;  %v1830_v18 = vpop.f32.mrb[52].mxu1  ;;  %v2021_v40 = vld [vmem:[%s3186_s22 + $0xd0] sm:$0xff] (%p2520_p5)  ;;  %2020 = vst [vmem:[%s3266_s9 + $0x188] sm:$0xff] (%p2520_p5), %v2019_v29 }
 0x69a   : > { %1941 = vst [vmem:[%s3186_s22 + $0xf0] sm:$0xff] %v1905_v50  ;;  %v1831_v1 = vadd.f32 %v1830_v18, %v1636_v27  ;;  %v1832_v48 = vpop.f32.mrb[53].mxu1  ;;  %2022 = vst [vmem:[%s3266_s9 + $0x1a0] sm:$0xff] (%p2520_p5), %v2021_v40  ;;  %v2023_v30 = vld [vmem:[%s3186_s22 + $0xd8] sm:$0xff] (%p2520_p5) }
 0x69b   : > { %1942 = vst [vmem:[%s3186_s22 + $0xf8] sm:$0xff] %v1906_v33  ;;  %v1833_v52 = vadd.f32 %v1832_v48, %v1636_v27  ;;  %v1834_v57 = vpop.f32.mrb[54].mxu1  ;;  %2024 = vst [vmem:[%s3266_s9 + $0x1a8] sm:$0xff] (%p2520_p5), %v2023_v30 }
 0x69c   : > { %v1871_v20 = vadd.f32 %v3110_v24, %v1831_v1  ;;  %v1835_v35 = vadd.f32 %v1834_v57, %v1641_v54  ;;  %v1836_v56 = vpop.f32.mrb[55].mxu1  ;;  %v1975_v24 = vld [vmem:[%s3186_s22 + $0x18] sm:$0xff] (%p2520_p5) }
 0x69d   : > { %v1872_v55 = vadd.f32 %v3098_v45, %v1833_v52  ;;  %v1837_v10 = vadd.f32 %v1836_v56, %v1641_v54  ;;  %1953 = sbr.rel (!%p2520_p5) target bundleno = 1708 (0x6ac), region = 75  ;;  %v1969_v45 = vld [vmem:[%s3186_s22] sm:$0xff] (%p2520_p5)  ;;  %1976 = vst [vmem:[%s3266_s9 + $0x28] sm:$0xff] (%p2520_p5), %v1975_v24 }
 0x69e   : > { %v1907_v38 = vmax.f32 %v1871_v20, 0.0  ;;  %v1873_v11 = vadd.f32 %v3106_v16, %v1835_v35  ;;  %v1973_v16 = vld [vmem:[%s3186_s22 + $0x10] sm:$0xff] (%p2520_p5)  ;;  %1970 = vst [vmem:[%s3266_s9] sm:$0xff] (%p2520_p5), %v1969_v45 }
 0x69f   : > { %v1908_v59 = vmax.f32 %v1872_v55, 0.0  ;;  %v1874_v0 = vadd.f32 %v3102_v13, %v1837_v10  ;;  %v1971_v13 = vld [vmem:[%s3186_s22 + $0x8] sm:$0xff] (%p2520_p5)  ;;  %1974 = vst [vmem:[%s3266_s9 + $0x20] sm:$0xff] (%p2520_p5), %v1973_v16  ;;  %v2025_v3 = vld [vmem:[%s3186_s22 + $0xe0] sm:$0xff] (%p2520_p5) }
 0x6a0   : > { %1943 = vst [vmem:[%s3186_s22 + $0x100] sm:$0xff] %v1907_v38  ;;  %v1909_v63 = vmax.f32 %v1873_v11, 0.0  ;;  %1972 = vst [vmem:[%s3266_s9 + $0x8] sm:$0xff] (%p2520_p5), %v1971_v13  ;;  %v2027_v31 = vld [vmem:[%s3186_s22 + $0xe8] sm:$0xff] (%p2520_p5) }
 0x6a1   : > { %1944 = vst [vmem:[%s3186_s22 + $0x108] sm:$0xff] %v1908_v59  ;;  %v1910_v4 = vmax.f32 %v1874_v0, 0.0  ;;  %2026 = vst [vmem:[%s3266_s9 + $0x1c0] sm:$0xff] (%p2520_p5), %v2025_v3  ;;  %v2029_v47 = vld [vmem:[%s3186_s22 + $0xf0] sm:$0xff] (%p2520_p5) }
 0x6a2   : > { %1945 = vst [vmem:[%s3186_s22 + $0x110] sm:$0xff] %v1909_v63  ;;  %2028 = vst [vmem:[%s3266_s9 + $0x1c8] sm:$0xff] (%p2520_p5), %v2027_v31  ;;  %v2031_v15 = vld [vmem:[%s3186_s22 + $0xf8] sm:$0xff] (%p2520_p5) }
 0x6a3   : > { %1946 = vst [vmem:[%s3186_s22 + $0x118] sm:$0xff] %v1910_v4  ;;  %2030 = vst [vmem:[%s3266_s9 + $0x1e0] sm:$0xff] (%p2520_p5), %v2029_v47 }
 0x6a4   : > { %2032 = vst [vmem:[%s3266_s9 + $0x1e8] sm:$0xff] %v2031_v15 }
 0x6a7   : > { %v2033_v36 = vld [vmem:[%s3186_s22 + $0x100] sm:$0xff] }
 0x6a8   : > { %2034 = vst [vmem:[%s3266_s9 + $0x200] sm:$0xff] %v2033_v36  ;;  %v2035_v44 = vld [vmem:[%s3186_s22 + $0x108] sm:$0xff] }
 0x6a9   : > { %v2037_v41 = vld [vmem:[%s3186_s22 + $0x110] sm:$0xff]  ;;  %2036 = vst [vmem:[%s3266_s9 + $0x208] sm:$0xff] %v2035_v44 }
 0x6aa   : > { %v2039_v51 = vld [vmem:[%s3186_s22 + $0x118] sm:$0xff]  ;;  %2038 = vst [vmem:[%s3266_s9 + $0x220] sm:$0xff] %v2037_v41 }
 0x6ab   : > { %2040 = vst [vmem:[%s3266_s9 + $0x228] sm:$0xff] %v2039_v51 }
 0x6ac PF: > { %p14_p10 = scmp.ge.s32.totalorder %s2507_s28, 4   ;;  %s3356_s24 = smov %s2439_s25 }
 0x6ad   : > { %s3357_s25 = smov %s2518_s8  ;;  %s3358_s26 = smov %s2507_s28 }
 0x6ae   :  { %16 = sbr.rel (!%p14_p10) target bundleno = 2 (0x2), region = 129 }

</bundles_post_ra>
